<compile_context>
chip_gen: v5e
topology: v5e:2x2
jax: 0.10.0
libtpu: 0.0.40
codegen_flags: <defaults>
</compile_context>

<pallas_src>
import functools

import numpy as np
import jax
import jax.numpy as jnp
from jax.experimental import pallas as pl
from jax.experimental.pallas import tpu as pltpu

EPS = 1e-5


# ------------------------------- fused kernel ------------------------------ #

def make_fused_block_kernel(Cin, Cout, H, W, RS, L, PADL, stride, has_proj,
                            cdtype):
    """Whole BasicBlock for one image: conv1+BN1+ReLU, conv2+BN2, shortcut, ReLU.

    Each 3x3 conv = 9 accumulating MXU matmuls against lane-offset slices of a
    zero-padded, row-strided flat activation held in VMEM scratch (no im2col).
    """
    OFF2 = PADL - (RS + 1)          # conv2 tap base offset inside h staging buf

    def tap(ref, off):
        # Column j of the tap is ref[:, off + stride * j], j = 0..L-1.
        if stride == 1:
            return ref[:, off:off + L]
        # TODO(synk): stride>1 lane-strided slice -- correct but untested/slow.
        win = ref[:, off:off + stride * (L - 1) + 1]
        return win[:, ::stride]

    def kernel(x_ref, mask_ref, w1_ref, w2_ref, b1_ref, b2_ref, o_ref,
               xbuf_ref, hbuf_ref):
        mask = mask_ref[...]                                   # (1, L)

        # ---- in-kernel zero padding: embed NCHW rows at row stride RS -------
        # (replaces the host-side jnp.pad -> one fewer HBM activation pass)
        # TODO(synk): zero only the pad/junk strips instead of the full buffer
        # once profiled at real activation sizes.
        xbuf_ref[...] = jnp.zeros_like(xbuf_ref)
        ximg = x_ref[0].astype(cdtype)                         # (Cin, H, W)
        for r in range(H):
            r0 = (r + 1) * RS + 1
            xbuf_ref[:, r0:r0 + W] = ximg[:, r, :]

        # ---- conv1 + BN1 + ReLU: 9 accumulating MXU matmuls ------------------
        acc = jnp.zeros((Cout, L), jnp.float32)
        for k in range(9):
            kh, kw = divmod(k, 3)
            acc += jnp.dot(w1_ref[:, k * Cin:(k + 1) * Cin],
                           tap(xbuf_ref, kh * RS + kw),
                           preferred_element_type=jnp.float32)
        h = jnp.maximum(acc + b1_ref[...], 0.0) * mask         # (Cout, L) f32

        # ---- stage h with zero edges so conv2 taps are plain lane slices -----
        hbuf_ref[:, 0:PADL] = jnp.zeros((Cout, PADL), cdtype)
        hbuf_ref[:, PADL + L:PADL + L + RS + 1] = jnp.zeros((Cout, RS + 1),
                                                            cdtype)
        hbuf_ref[:, PADL:PADL + L] = h.astype(cdtype)          # lane-aligned store

        # ---- conv2 + BN2 (+ folded shortcut): 9 more accumulating matmuls ----
        acc = jnp.zeros((Cout, L), jnp.float32)
        for k in range(9):
            kh, kw = divmod(k, 3)
            off = OFF2 + kh * RS + kw
            acc += jnp.dot(w2_ref[:, k * Cout:(k + 1) * Cout],
                           hbuf_ref[:, off:off + L],
                           preferred_element_type=jnp.float32)
        y = acc + b2_ref[...]
        if has_proj:
            # BN-folded 1x1 projection shortcut on the centre input tap.
            y += jnp.dot(w2_ref[:, 9 * Cout:9 * Cout + Cin],
                         tap(xbuf_ref, RS + 1),
                         preferred_element_type=jnp.float32)
        else:
            y += tap(xbuf_ref, RS + 1).astype(jnp.float32)     # identity shortcut
        o_ref[0] = jnp.maximum(y, 0.0).astype(o_ref.dtype)     # lane-dense store

    return kernel


# --------------------------------- wrapper --------------------------------- #

def _fold_bn(gamma, beta, mean, var):
    s = gamma / jnp.sqrt(var + EPS)
    return s, beta - mean * s


def _pick_row_stride(H1, W):
    """Smallest row stride >= W+2 making H1*RS a multiple of 128 (lane dense)."""
    base = W + 2
    for rs in range(base, base + 129):
        if (H1 * rs) % 128 == 0 and rs <= 2 * base:
            return rs
    return base


def _vmem_bytes(shape, dtype):
    """Generous VMEM footprint of one buffer, rounded up to (8, 128) tiles."""
    shape = tuple(int(d) for d in shape)
    if len(shape) < 2:
        shape = (1,) * (2 - len(shape)) + shape
    lead = 1
    for d in shape[:-2]:
        lead *= d
    sub = -(-shape[-2] // 8) * 8
    lane = -(-shape[-1] // 128) * 128
    return lead * sub * lane * np.dtype(dtype).itemsize


@functools.partial(jax.jit, static_argnames=("stride", "compute_dtype"))
def basic_block_forward(x_nchw, params, stride=1, compute_dtype=jnp.bfloat16):
    """BasicBlock forward. NCHW float32 in / NCHW float32 out (PyTorch layout).

    compute_dtype is the MXU-operand / scratch dtype: bf16 is the native MXU
    path on all generations (v5e included, per review); f32 gives bit-tight
    results.  Accumulation and the BN/ReLU epilogue are always f32.
    """
    N, Cin, H, W = x_nchw.shape
    w1, w2 = params["w1"], params["w2"]       # HWIO: (3,3,Cin,Cout), (3,3,Cout,Cout)
    Cout = w1.shape[-1]
    H1 = (H - 1) // stride + 1
    W1 = (W - 1) // stride + 1
    has_proj = (stride != 1) or (Cin != Cout)

    RS = _pick_row_stride(H1, W)              # padded row stride (24 for W=16)
    L = H1 * RS                               # flat spatial extent (lane dim)
    # Enough padded rows so every tap slice of the flat input stays in bounds.
    Hp = max(-(-(2 * RS + 3 + stride * (L - 1)) // RS), H + 2)
    PADL = -(-(RS + 1) // 128) * 128          # left pad of h staging (aligned)
    Lh = PADL + L + (RS + 1)                  # h staging buffer lane extent

    # ---- fold eval-mode BN into packed conv weights / biases (host side) ----
    s1, b1 = _fold_bn(*params["bn1"])
    s2, b2 = _fold_bn(*params["bn2"])
    w1p = (jnp.transpose(w1, (3, 0, 1, 2)).reshape(Cout, 9 * Cin)
           * s1[:, None]).astype(compute_dtype)
    w2p = jnp.transpose(w2, (3, 0, 1, 2)).reshape(Cout, 9 * Cout) * s2[:, None]
    if has_proj:
        ss, bs = _fold_bn(*params["bn_s"])
        wsp = params["ws"].T * ss[:, None]                    # (Cout, Cin)
        w2p = jnp.concatenate([w2p, wsp], axis=1)             # shortcut columns
        b2 = b2 + bs
    w2p = w2p.astype(compute_dtype)
    b1 = b1.reshape(Cout, 1).astype(jnp.float32)
    b2 = b2.reshape(Cout, 1).astype(jnp.float32)
    K2 = w2p.shape[1]

    # Junk-column mask for the flat layout (1.0 on real output columns).
    mask = ((jnp.arange(L, dtype=jnp.int32) % RS) < W1
            ).astype(jnp.float32).reshape(1, L)

    # ---- explicit scoped-VMEM budget from the actual buffers (review item) ----
    dbl = 2 * (_vmem_bytes((1, Cin, H, W), x_nchw.dtype)
               + _vmem_bytes((1, L), jnp.float32)
               + _vmem_bytes((Cout, 9 * Cin), compute_dtype)
               + _vmem_bytes((Cout, K2), compute_dtype)
               + 2 * _vmem_bytes((Cout, 1), jnp.float32)
               + _vmem_bytes((1, Cout, L), jnp.float32))
    scr = (_vmem_bytes((Cin, Hp * RS), compute_dtype)
           + _vmem_bytes((Cout, Lh), compute_dtype))
    vmem_limit = int(min(64 * 2**20, max(32 * 2**20, 2 * (dbl + scr))))

    kernel = make_fused_block_kernel(Cin, Cout, H, W, RS, L, PADL, stride,
                                     has_proj, compute_dtype)
    out_flat = pl.pallas_call(
        kernel,
        out_shape=jax.ShapeDtypeStruct((N, Cout, L), jnp.float32),
        grid=(N,),
        in_specs=[
            pl.BlockSpec((1, Cin, H, W), lambda n: (n, 0, 0, 0)),   # raw NCHW image
            pl.BlockSpec((1, L), lambda n: (0, 0)),                 # junk-col mask
            pl.BlockSpec((Cout, 9 * Cin), lambda n: (0, 0)),        # conv1 weights
            pl.BlockSpec((Cout, K2), lambda n: (0, 0)),             # conv2(+sc) w
            pl.BlockSpec((Cout, 1), lambda n: (0, 0)),              # bias1
            pl.BlockSpec((Cout, 1), lambda n: (0, 0)),              # bias2(+sc)
        ],
        out_specs=pl.BlockSpec((1, Cout, L), lambda n: (n, 0, 0)),
        scratch_shapes=[
            pltpu.VMEM((Cin, Hp * RS), compute_dtype),   # padded-flat input
            pltpu.VMEM((Cout, Lh), compute_dtype),       # zero-edged h staging
        ],
        compiler_params=pltpu.CompilerParams(
            dimension_semantics=("parallel",),
            vmem_limit_bytes=vmem_limit),
    )(x_nchw, mask, w1p, w2p, b1, b2)

    # Drop the junk (row-stride padding) columns -> NCHW output, no transpose.
    # TODO(synk): when chaining blocks, keep the padded-flat layout between
    # kernels and let the final consumer crop, avoiding this extra HBM pass.
    return out_flat.reshape(N, Cout, H1, RS)[:, :, :, :W1]


# ----------------------------- pure-JAX reference --------------------------- #

def reference_forward(x, params, stride):
    def conv(v, w, s, pad):
        return jax.lax.conv_general_dilated(
            v, w, (s, s), [(pad, pad), (pad, pad)],
            dimension_numbers=("NCHW", "HWIO", "NCHW"))

    def bn(v, p):
        g, b, m, var = (t.reshape(1, -1, 1, 1) for t in p)
        return (v - m) / jnp.sqrt(var + EPS) * g + b

    h = jax.nn.relu(bn(conv(x, params["w1"], stride, 1), params["bn1"]))
    y = bn(conv(h, params["w2"], 1, 1), params["bn2"])
    Cin, Cout = x.shape[1], params["w1"].shape[-1]
    if stride != 1 or Cin != Cout:
        sc = bn(conv(x, params["ws"].reshape(1, 1, Cin, Cout), stride, 0),
                params["bn_s"])
    else:
        sc = x
    return jax.nn.relu(y + sc)


# ------------------------------------ main ---------------------------------- #

if __name__ == "__main__":
    key = jax.random.PRNGKey(0)

    def bn_params(k, c):
        k1, k2, k3, k4 = jax.random.split(k, 4)
        return (1.0 + 0.1 * jax.random.normal(k1, (c,), jnp.float32),
                0.1 * jax.random.normal(k2, (c,), jnp.float32),
                0.1 * jax.random.normal(k3, (c,), jnp.float32),
                1.0 + 0.1 * jax.random.uniform(k4, (c,), jnp.float32))

    def make_params(k, cin, cout):
        ks = jax.random.split(k, 6)
        return {
            "w1": 0.2 * jax.random.normal(ks[0], (3, 3, cin, cout), jnp.float32),
            "w2": 0.2 * jax.random.normal(ks[1], (3, 3, cout, cout), jnp.float32),
            "ws": 0.2 * jax.random.normal(ks[2], (cin, cout), jnp.float32),
            "bn1": bn_params(ks[3], cout),
            "bn2": bn_params(ks[4], cout),
            "bn_s": bn_params(ks[5], cout),
        }

    N, H, W = 2, 16, 16
    kx, kp1, kp2 = jax.random.split(key, 3)

    # 1) Projection-shortcut block (in_c != out_c), f32 MXU path: tight check.
    in_c, out_c, stride = 4, 8, 1
    x = jax.random.normal(kx, (N, in_c, H, W), jnp.float32)
    params = make_params(kp1, in_c, out_c)
    out = jax.block_until_ready(
        basic_block_forward(x, params, stride=stride, compute_dtype=jnp.float32))
    ref = reference_forward(x, params, stride)
    assert out.shape == (N, out_c, H, W), out.shape
    assert jnp.allclose(out, ref, atol=1e-3, rtol=1e-3), \
        float(jnp.max(jnp.abs(out - ref)))

    # 2) Identity-shortcut block (in_c == out_c, stride 1), f32 path.
    x_id = jax.random.normal(kx, (N, out_c, H, W), jnp.float32)
    params_id = make_params(kp2, out_c, out_c)
    out_id = jax.block_until_ready(
        basic_block_forward(x_id, params_id, stride=1,
                            compute_dtype=jnp.float32))
    ref_id = reference_forward(x_id, params_id, 1)
    assert jnp.allclose(out_id, ref_id, atol=1e-3, rtol=1e-3), \
        float(jnp.max(jnp.abs(out_id - ref_id)))

    # 3) Default bf16 MXU fast path (all generations): loose tolerance.
    out_bf = jax.block_until_ready(
        basic_block_forward(x, params, stride=stride))
    assert float(jnp.max(jnp.abs(out_bf - ref))) < 0.25

    print("KERNEL_OK")
</pallas_src>

<mosaic_0001>
module attributes {stable_mosaic.version = 11 : i64} {
  func.func @kernel(%arg0: i32, %arg1: memref<1x4x16x16xf32, #tpu.memory_space<vmem>>, %arg2: memref<1x384xf32, #tpu.memory_space<vmem>>, %arg3: memref<8x36xf32, #tpu.memory_space<vmem>>, %arg4: memref<8x76xf32, #tpu.memory_space<vmem>>, %arg5: memref<8x1xf32, #tpu.memory_space<vmem>>, %arg6: memref<8x1xf32, #tpu.memory_space<vmem>>, %arg7: memref<1x8x384xf32, #tpu.memory_space<vmem>>, %arg8: memref<4x456xf32, #tpu.memory_space<vmem>>, %arg9: memref<8x537xf32, #tpu.memory_space<vmem>>) attributes {dimension_semantics = [#tpu.dimension_semantics<parallel>], iteration_bounds = array<i64: 2>, scalar_prefetch = 0 : i64, scratch_operands = 2 : i64, tpu.core_type = #tpu.core_type<tc>, window_params = [{transform_indices = @transform_0, window_bounds = array<i64: 1, 4, 16, 16>}, {pipeline_mode = #tpu.pipeline_mode<synchronous>, transform_indices = @transform_1, window_bounds = array<i64: 1, 384>}, {pipeline_mode = #tpu.pipeline_mode<synchronous>, transform_indices = @transform_2, window_bounds = array<i64: 8, 36>}, {pipeline_mode = #tpu.pipeline_mode<synchronous>, transform_indices = @transform_3, window_bounds = array<i64: 8, 76>}, {pipeline_mode = #tpu.pipeline_mode<synchronous>, transform_indices = @transform_4, window_bounds = array<i64: 8, 1>}, {pipeline_mode = #tpu.pipeline_mode<synchronous>, transform_indices = @transform_5, window_bounds = array<i64: 8, 1>}, {transform_indices = @transform_6, window_bounds = array<i64: 1, 8, 384>}]} {
    %c0 = arith.constant 0 : index
    %c0_0 = arith.constant 0 : index
    %0 = vector.load %arg2[%c0, %c0_0] : memref<1x384xf32, #tpu.memory_space<vmem>>, vector<1x384xf32>
    %cst = arith.constant 0.000000e+00 : f32
    %1 = vector.broadcast %cst : f32 to vector<4x456xf32>
    %c0_1 = arith.constant 0 : index
    %c0_2 = arith.constant 0 : index
    %2 = vector.load %arg8[%c0_1, %c0_2] : memref<4x456xf32, #tpu.memory_space<vmem>>, vector<4x456xf32>
    tpu.vector_store %arg8[%c0_1, %c0_2], %1 {strides = array<i32>} : memref<4x456xf32, #tpu.memory_space<vmem>>, vector<4x456xf32>,
    %c0_3 = arith.constant 0 : index
    %c0_4 = arith.constant 0 : index
    %c0_5 = arith.constant 0 : index
    %c0_6 = arith.constant 0 : index
    %3 = vector.load %arg1[%c0_3, %c0_4, %c0_5, %c0_6] : memref<1x4x16x16xf32, #tpu.memory_space<vmem>>, vector<1x4x16x16xf32>
    %4 = vector.shape_cast %3 : vector<1x4x16x16xf32> to vector<4x16x16xf32>
    %5 = vector.extract_strided_slice %4 {offsets = [0, 0, 0], sizes = [4, 1, 16], strides = [1, 1, 1]} : vector<4x16x16xf32> to vector<4x1x16xf32>
    %6 = vector.shape_cast %5 : vector<4x1x16xf32> to vector<4x16xf32>
    %c0_7 = arith.constant 0 : index
    %c25 = arith.constant 25 : index
    %7 = vector.load %arg8[%c0_7, %c25] : memref<4x456xf32, #tpu.memory_space<vmem>>, vector<4x16xf32>
    tpu.vector_store %arg8[%c0_7, %c25], %6 {strides = array<i32>} : memref<4x456xf32, #tpu.memory_space<vmem>>, vector<4x16xf32>,
    %8 = vector.extract_strided_slice %4 {offsets = [0, 1, 0], sizes = [4, 1, 16], strides = [1, 1, 1]} : vector<4x16x16xf32> to vector<4x1x16xf32>
    %9 = vector.shape_cast %8 : vector<4x1x16xf32> to vector<4x16xf32>
    %c0_8 = arith.constant 0 : index
    %c49 = arith.constant 49 : index
    %10 = vector.load %arg8[%c0_8, %c49] : memref<4x456xf32, #tpu.memory_space<vmem>>, vector<4x16xf32>
    tpu.vector_store %arg8[%c0_8, %c49], %9 {strides = array<i32>} : memref<4x456xf32, #tpu.memory_space<vmem>>, vector<4x16xf32>,
    %11 = vector.extract_strided_slice %4 {offsets = [0, 2, 0], sizes = [4, 1, 16], strides = [1, 1, 1]} : vector<4x16x16xf32> to vector<4x1x16xf32>
    %12 = vector.shape_cast %11 : vector<4x1x16xf32> to vector<4x16xf32>
    %c0_9 = arith.constant 0 : index
    %c73 = arith.constant 73 : index
    %13 = vector.load %arg8[%c0_9, %c73] : memref<4x456xf32, #tpu.memory_space<vmem>>, vector<4x16xf32>
    tpu.vector_store %arg8[%c0_9, %c73], %12 {strides = array<i32>} : memref<4x456xf32, #tpu.memory_space<vmem>>, vector<4x16xf32>,
    %14 = vector.extract_strided_slice %4 {offsets = [0, 3, 0], sizes = [4, 1, 16], strides = [1, 1, 1]} : vector<4x16x16xf32> to vector<4x1x16xf32>
    %15 = vector.shape_cast %14 : vector<4x1x16xf32> to vector<4x16xf32>
    %c0_10 = arith.constant 0 : index
    %c97 = arith.constant 97 : index
    %16 = vector.load %arg8[%c0_10, %c97] : memref<4x456xf32, #tpu.memory_space<vmem>>, vector<4x16xf32>
    tpu.vector_store %arg8[%c0_10, %c97], %15 {strides = array<i32>} : memref<4x456xf32, #tpu.memory_space<vmem>>, vector<4x16xf32>,
    %17 = vector.extract_strided_slice %4 {offsets = [0, 4, 0], sizes = [4, 1, 16], strides = [1, 1, 1]} : vector<4x16x16xf32> to vector<4x1x16xf32>
    %18 = vector.shape_cast %17 : vector<4x1x16xf32> to vector<4x16xf32>
    %c0_11 = arith.constant 0 : index
    %c121 = arith.constant 121 : index
    %19 = vector.load %arg8[%c0_11, %c121] : memref<4x456xf32, #tpu.memory_space<vmem>>, vector<4x16xf32>
    tpu.vector_store %arg8[%c0_11, %c121], %18 {strides = array<i32>} : memref<4x456xf32, #tpu.memory_space<vmem>>, vector<4x16xf32>,
    %20 = vector.extract_strided_slice %4 {offsets = [0, 5, 0], sizes = [4, 1, 16], strides = [1, 1, 1]} : vector<4x16x16xf32> to vector<4x1x16xf32>
    %21 = vector.shape_cast %20 : vector<4x1x16xf32> to vector<4x16xf32>
    %c0_12 = arith.constant 0 : index
    %c145 = arith.constant 145 : index
    %22 = vector.load %arg8[%c0_12, %c145] : memref<4x456xf32, #tpu.memory_space<vmem>>, vector<4x16xf32>
    tpu.vector_store %arg8[%c0_12, %c145], %21 {strides = array<i32>} : memref<4x456xf32, #tpu.memory_space<vmem>>, vector<4x16xf32>,
    %23 = vector.extract_strided_slice %4 {offsets = [0, 6, 0], sizes = [4, 1, 16], strides = [1, 1, 1]} : vector<4x16x16xf32> to vector<4x1x16xf32>
    %24 = vector.shape_cast %23 : vector<4x1x16xf32> to vector<4x16xf32>
    %c0_13 = arith.constant 0 : index
    %c169 = arith.constant 169 : index
    %25 = vector.load %arg8[%c0_13, %c169] : memref<4x456xf32, #tpu.memory_space<vmem>>, vector<4x16xf32>
    tpu.vector_store %arg8[%c0_13, %c169], %24 {strides = array<i32>} : memref<4x456xf32, #tpu.memory_space<vmem>>, vector<4x16xf32>,
    %26 = vector.extract_strided_slice %4 {offsets = [0, 7, 0], sizes = [4, 1, 16], strides = [1, 1, 1]} : vector<4x16x16xf32> to vector<4x1x16xf32>
    %27 = vector.shape_cast %26 : vector<4x1x16xf32> to vector<4x16xf32>
    %c0_14 = arith.constant 0 : index
    %c193 = arith.constant 193 : index
    %28 = vector.load %arg8[%c0_14, %c193] : memref<4x456xf32, #tpu.memory_space<vmem>>, vector<4x16xf32>
    tpu.vector_store %arg8[%c0_14, %c193], %27 {strides = array<i32>} : memref<4x456xf32, #tpu.memory_space<vmem>>, vector<4x16xf32>,
    %29 = vector.extract_strided_slice %4 {offsets = [0, 8, 0], sizes = [4, 1, 16], strides = [1, 1, 1]} : vector<4x16x16xf32> to vector<4x1x16xf32>
    %30 = vector.shape_cast %29 : vector<4x1x16xf32> to vector<4x16xf32>
    %c0_15 = arith.constant 0 : index
    %c217 = arith.constant 217 : index
    %31 = vector.load %arg8[%c0_15, %c217] : memref<4x456xf32, #tpu.memory_space<vmem>>, vector<4x16xf32>
    tpu.vector_store %arg8[%c0_15, %c217], %30 {strides = array<i32>} : memref<4x456xf32, #tpu.memory_space<vmem>>, vector<4x16xf32>,
    %32 = vector.extract_strided_slice %4 {offsets = [0, 9, 0], sizes = [4, 1, 16], strides = [1, 1, 1]} : vector<4x16x16xf32> to vector<4x1x16xf32>
    %33 = vector.shape_cast %32 : vector<4x1x16xf32> to vector<4x16xf32>
    %c0_16 = arith.constant 0 : index
    %c241 = arith.constant 241 : index
    %34 = vector.load %arg8[%c0_16, %c241] : memref<4x456xf32, #tpu.memory_space<vmem>>, vector<4x16xf32>
    tpu.vector_store %arg8[%c0_16, %c241], %33 {strides = array<i32>} : memref<4x456xf32, #tpu.memory_space<vmem>>, vector<4x16xf32>,
    %35 = vector.extract_strided_slice %4 {offsets = [0, 10, 0], sizes = [4, 1, 16], strides = [1, 1, 1]} : vector<4x16x16xf32> to vector<4x1x16xf32>
    %36 = vector.shape_cast %35 : vector<4x1x16xf32> to vector<4x16xf32>
    %c0_17 = arith.constant 0 : index
    %c265 = arith.constant 265 : index
    %37 = vector.load %arg8[%c0_17, %c265] : memref<4x456xf32, #tpu.memory_space<vmem>>, vector<4x16xf32>
    tpu.vector_store %arg8[%c0_17, %c265], %36 {strides = array<i32>} : memref<4x456xf32, #tpu.memory_space<vmem>>, vector<4x16xf32>,
    %38 = vector.extract_strided_slice %4 {offsets = [0, 11, 0], sizes = [4, 1, 16], strides = [1, 1, 1]} : vector<4x16x16xf32> to vector<4x1x16xf32>
    %39 = vector.shape_cast %38 : vector<4x1x16xf32> to vector<4x16xf32>
    %c0_18 = arith.constant 0 : index
    %c289 = arith.constant 289 : index
    %40 = vector.load %arg8[%c0_18, %c289] : memref<4x456xf32, #tpu.memory_space<vmem>>, vector<4x16xf32>
    tpu.vector_store %arg8[%c0_18, %c289], %39 {strides = array<i32>} : memref<4x456xf32, #tpu.memory_space<vmem>>, vector<4x16xf32>,
    %41 = vector.extract_strided_slice %4 {offsets = [0, 12, 0], sizes = [4, 1, 16], strides = [1, 1, 1]} : vector<4x16x16xf32> to vector<4x1x16xf32>
    %42 = vector.shape_cast %41 : vector<4x1x16xf32> to vector<4x16xf32>
    %c0_19 = arith.constant 0 : index
    %c313 = arith.constant 313 : index
    %43 = vector.load %arg8[%c0_19, %c313] : memref<4x456xf32, #tpu.memory_space<vmem>>, vector<4x16xf32>
    tpu.vector_store %arg8[%c0_19, %c313], %42 {strides = array<i32>} : memref<4x456xf32, #tpu.memory_space<vmem>>, vector<4x16xf32>,
    %44 = vector.extract_strided_slice %4 {offsets = [0, 13, 0], sizes = [4, 1, 16], strides = [1, 1, 1]} : vector<4x16x16xf32> to vector<4x1x16xf32>
    %45 = vector.shape_cast %44 : vector<4x1x16xf32> to vector<4x16xf32>
    %c0_20 = arith.constant 0 : index
    %c337 = arith.constant 337 : index
    %46 = vector.load %arg8[%c0_20, %c337] : memref<4x456xf32, #tpu.memory_space<vmem>>, vector<4x16xf32>
    tpu.vector_store %arg8[%c0_20, %c337], %45 {strides = array<i32>} : memref<4x456xf32, #tpu.memory_space<vmem>>, vector<4x16xf32>,
    %47 = vector.extract_strided_slice %4 {offsets = [0, 14, 0], sizes = [4, 1, 16], strides = [1, 1, 1]} : vector<4x16x16xf32> to vector<4x1x16xf32>
    %48 = vector.shape_cast %47 : vector<4x1x16xf32> to vector<4x16xf32>
    %c0_21 = arith.constant 0 : index
    %c361 = arith.constant 361 : index
    %49 = vector.load %arg8[%c0_21, %c361] : memref<4x456xf32, #tpu.memory_space<vmem>>, vector<4x16xf32>
    tpu.vector_store %arg8[%c0_21, %c361], %48 {strides = array<i32>} : memref<4x456xf32, #tpu.memory_space<vmem>>, vector<4x16xf32>,
    %50 = vector.extract_strided_slice %4 {offsets = [0, 15, 0], sizes = [4, 1, 16], strides = [1, 1, 1]} : vector<4x16x16xf32> to vector<4x1x16xf32>
    %51 = vector.shape_cast %50 : vector<4x1x16xf32> to vector<4x16xf32>
    %c0_22 = arith.constant 0 : index
    %c385 = arith.constant 385 : index
    %52 = vector.load %arg8[%c0_22, %c385] : memref<4x456xf32, #tpu.memory_space<vmem>>, vector<4x16xf32>
    tpu.vector_store %arg8[%c0_22, %c385], %51 {strides = array<i32>} : memref<4x456xf32, #tpu.memory_space<vmem>>, vector<4x16xf32>,
    %cst_23 = arith.constant 0.000000e+00 : f32
    %53 = vector.broadcast %cst_23 : f32 to vector<8x384xf32>
    %c0_24 = arith.constant 0 : index
    %c0_25 = arith.constant 0 : index
    %54 = vector.load %arg3[%c0_24, %c0_25] : memref<8x36xf32, #tpu.memory_space<vmem>>, vector<8x4xf32>
    %c0_26 = arith.constant 0 : index
    %c0_27 = arith.constant 0 : index
    %55 = vector.load %arg8[%c0_26, %c0_27] : memref<4x456xf32, #tpu.memory_space<vmem>>, vector<4x384xf32>
    %cst_28 = arith.constant dense<0.000000e+00> : vector<8x384xf32>
    %56 = tpu.matmul %54, %55, %cst_28 {dimension_numbers = #tpu.dot_dimension_numbers<[1], [0], [0], [1], [0, 0, 1, 1], [], []>} : vector<8x4xf32>, vector<4x384xf32>, vector<8x384xf32> -> vector<8x384xf32>
    %57 = arith.addf %53, %56 : vector<8x384xf32>
    %c0_29 = arith.constant 0 : index
    %c4 = arith.constant 4 : index
    %58 = vector.load %arg3[%c0_29, %c4] : memref<8x36xf32, #tpu.memory_space<vmem>>, vector<8x4xf32>
    %c0_30 = arith.constant 0 : index
    %c1 = arith.constant 1 : index
    %59 = vector.load %arg8[%c0_30, %c1] : memref<4x456xf32, #tpu.memory_space<vmem>>, vector<4x384xf32>
    %cst_31 = arith.constant dense<0.000000e+00> : vector<8x384xf32>
    %60 = tpu.matmul %58, %59, %cst_31 {dimension_numbers = #tpu.dot_dimension_numbers<[1], [0], [0], [1], [0, 0, 1, 1], [], []>} : vector<8x4xf32>, vector<4x384xf32>, vector<8x384xf32> -> vector<8x384xf32>
    %61 = arith.addf %57, %60 : vector<8x384xf32>
    %c0_32 = arith.constant 0 : index
    %c8 = arith.constant 8 : index
    %62 = vector.load %arg3[%c0_32, %c8] : memref<8x36xf32, #tpu.memory_space<vmem>>, vector<8x4xf32>
    %c0_33 = arith.constant 0 : index
    %c2 = arith.constant 2 : index
    %63 = vector.load %arg8[%c0_33, %c2] : memref<4x456xf32, #tpu.memory_space<vmem>>, vector<4x384xf32>
    %cst_34 = arith.constant dense<0.000000e+00> : vector<8x384xf32>
    %64 = tpu.matmul %62, %63, %cst_34 {dimension_numbers = #tpu.dot_dimension_numbers<[1], [0], [0], [1], [0, 0, 1, 1], [], []>} : vector<8x4xf32>, vector<4x384xf32>, vector<8x384xf32> -> vector<8x384xf32>
    %65 = arith.addf %61, %64 : vector<8x384xf32>
    %c0_35 = arith.constant 0 : index
    %c12 = arith.constant 12 : index
    %66 = vector.load %arg3[%c0_35, %c12] : memref<8x36xf32, #tpu.memory_space<vmem>>, vector<8x4xf32>
    %c0_36 = arith.constant 0 : index
    %c24 = arith.constant 24 : index
    %67 = vector.load %arg8[%c0_36, %c24] : memref<4x456xf32, #tpu.memory_space<vmem>>, vector<4x384xf32>
    %cst_37 = arith.constant dense<0.000000e+00> : vector<8x384xf32>
    %68 = tpu.matmul %66, %67, %cst_37 {dimension_numbers = #tpu.dot_dimension_numbers<[1], [0], [0], [1], [0, 0, 1, 1], [], []>} : vector<8x4xf32>, vector<4x384xf32>, vector<8x384xf32> -> vector<8x384xf32>
    %69 = arith.addf %65, %68 : vector<8x384xf32>
    %c0_38 = arith.constant 0 : index
    %c16 = arith.constant 16 : index
    %70 = vector.load %arg3[%c0_38, %c16] : memref<8x36xf32, #tpu.memory_space<vmem>>, vector<8x4xf32>
    %c0_39 = arith.constant 0 : index
    %c25_40 = arith.constant 25 : index
    %71 = vector.load %arg8[%c0_39, %c25_40] : memref<4x456xf32, #tpu.memory_space<vmem>>, vector<4x384xf32>
    %cst_41 = arith.constant dense<0.000000e+00> : vector<8x384xf32>
    %72 = tpu.matmul %70, %71, %cst_41 {dimension_numbers = #tpu.dot_dimension_numbers<[1], [0], [0], [1], [0, 0, 1, 1], [], []>} : vector<8x4xf32>, vector<4x384xf32>, vector<8x384xf32> -> vector<8x384xf32>
    %73 = arith.addf %69, %72 : vector<8x384xf32>
    %c0_42 = arith.constant 0 : index
    %c20 = arith.constant 20 : index
    %74 = vector.load %arg3[%c0_42, %c20] : memref<8x36xf32, #tpu.memory_space<vmem>>, vector<8x4xf32>
    %c0_43 = arith.constant 0 : index
    %c26 = arith.constant 26 : index
    %75 = vector.load %arg8[%c0_43, %c26] : memref<4x456xf32, #tpu.memory_space<vmem>>, vector<4x384xf32>
    %cst_44 = arith.constant dense<0.000000e+00> : vector<8x384xf32>
    %76 = tpu.matmul %74, %75, %cst_44 {dimension_numbers = #tpu.dot_dimension_numbers<[1], [0], [0], [1], [0, 0, 1, 1], [], []>} : vector<8x4xf32>, vector<4x384xf32>, vector<8x384xf32> -> vector<8x384xf32>
    %77 = arith.addf %73, %76 : vector<8x384xf32>
    %c0_45 = arith.constant 0 : index
    %c24_46 = arith.constant 24 : index
    %78 = vector.load %arg3[%c0_45, %c24_46] : memref<8x36xf32, #tpu.memory_space<vmem>>, vector<8x4xf32>
    %c0_47 = arith.constant 0 : index
    %c48 = arith.constant 48 : index
    %79 = vector.load %arg8[%c0_47, %c48] : memref<4x456xf32, #tpu.memory_space<vmem>>, vector<4x384xf32>
    %cst_48 = arith.constant dense<0.000000e+00> : vector<8x384xf32>
    %80 = tpu.matmul %78, %79, %cst_48 {dimension_numbers = #tpu.dot_dimension_numbers<[1], [0], [0], [1], [0, 0, 1, 1], [], []>} : vector<8x4xf32>, vector<4x384xf32>, vector<8x384xf32> -> vector<8x384xf32>
    %81 = arith.addf %77, %80 : vector<8x384xf32>
    %c0_49 = arith.constant 0 : index
    %c28 = arith.constant 28 : index
    %82 = vector.load %arg3[%c0_49, %c28] : memref<8x36xf32, #tpu.memory_space<vmem>>, vector<8x4xf32>
    %c0_50 = arith.constant 0 : index
    %c49_51 = arith.constant 49 : index
    %83 = vector.load %arg8[%c0_50, %c49_51] : memref<4x456xf32, #tpu.memory_space<vmem>>, vector<4x384xf32>
    %cst_52 = arith.constant dense<0.000000e+00> : vector<8x384xf32>
    %84 = tpu.matmul %82, %83, %cst_52 {dimension_numbers = #tpu.dot_dimension_numbers<[1], [0], [0], [1], [0, 0, 1, 1], [], []>} : vector<8x4xf32>, vector<4x384xf32>, vector<8x384xf32> -> vector<8x384xf32>
    %85 = arith.addf %81, %84 : vector<8x384xf32>
    %c0_53 = arith.constant 0 : index
    %c32 = arith.constant 32 : index
    %86 = vector.load %arg3[%c0_53, %c32] : memref<8x36xf32, #tpu.memory_space<vmem>>, vector<8x4xf32>
    %c0_54 = arith.constant 0 : index
    %c50 = arith.constant 50 : index
    %87 = vector.load %arg8[%c0_54, %c50] : memref<4x456xf32, #tpu.memory_space<vmem>>, vector<4x384xf32>
    %cst_55 = arith.constant dense<0.000000e+00> : vector<8x384xf32>
    %88 = tpu.matmul %86, %87, %cst_55 {dimension_numbers = #tpu.dot_dimension_numbers<[1], [0], [0], [1], [0, 0, 1, 1], [], []>} : vector<8x4xf32>, vector<4x384xf32>, vector<8x384xf32> -> vector<8x384xf32>
    %89 = arith.addf %85, %88 : vector<8x384xf32>
    %c0_56 = arith.constant 0 : index
    %c0_57 = arith.constant 0 : index
    %90 = vector.load %arg5[%c0_56, %c0_57] : memref<8x1xf32, #tpu.memory_space<vmem>>, vector<8x1xf32>
    %91 = vector.broadcast %90 : vector<8x1xf32> to vector<8x384xf32>
    %92 = arith.addf %89, %91 : vector<8x384xf32>
    %cst_58 = arith.constant 0.000000e+00 : f32
    %93 = vector.broadcast %cst_58 : f32 to vector<8x384xf32>
    %94 = arith.maximumf %92, %93 : vector<8x384xf32>
    %95 = vector.broadcast %0 : vector<1x384xf32> to vector<8x384xf32>
    %96 = arith.mulf %94, %95 : vector<8x384xf32>
    %cst_59 = arith.constant 0.000000e+00 : f32
    %97 = vector.broadcast %cst_59 : f32 to vector<8x128xf32>
    %c0_60 = arith.constant 0 : index
    %c0_61 = arith.constant 0 : index
    %98 = vector.load %arg9[%c0_60, %c0_61] : memref<8x537xf32, #tpu.memory_space<vmem>>, vector<8x128xf32>
    tpu.vector_store %arg9[%c0_60, %c0_61], %97 {strides = array<i32>} : memref<8x537xf32, #tpu.memory_space<vmem>>, vector<8x128xf32>,
    %cst_62 = arith.constant 0.000000e+00 : f32
    %99 = vector.broadcast %cst_62 : f32 to vector<8x25xf32>
    %c0_63 = arith.constant 0 : index
    %c512 = arith.constant 512 : index
    %100 = vector.load %arg9[%c0_63, %c512] : memref<8x537xf32, #tpu.memory_space<vmem>>, vector<8x25xf32>
    tpu.vector_store %arg9[%c0_63, %c512], %99 {strides = array<i32>} : memref<8x537xf32, #tpu.memory_space<vmem>>, vector<8x25xf32>,
    %c0_64 = arith.constant 0 : index
    %c128 = arith.constant 128 : index
    %101 = vector.load %arg9[%c0_64, %c128] : memref<8x537xf32, #tpu.memory_space<vmem>>, vector<8x384xf32>
    tpu.vector_store %arg9[%c0_64, %c128], %96 {strides = array<i32>} : memref<8x537xf32, #tpu.memory_space<vmem>>, vector<8x384xf32>,
    %cst_65 = arith.constant 0.000000e+00 : f32
    %102 = vector.broadcast %cst_65 : f32 to vector<8x384xf32>
    %c0_66 = arith.constant 0 : index
    %c0_67 = arith.constant 0 : index
    %103 = vector.load %arg4[%c0_66, %c0_67] : memref<8x76xf32, #tpu.memory_space<vmem>>, vector<8x8xf32>
    %c0_68 = arith.constant 0 : index
    %c103 = arith.constant 103 : index
    %104 = vector.load %arg9[%c0_68, %c103] : memref<8x537xf32, #tpu.memory_space<vmem>>, vector<8x384xf32>
    %cst_69 = arith.constant dense<0.000000e+00> : vector<8x384xf32>
    %105 = tpu.matmul %103, %104, %cst_69 {dimension_numbers = #tpu.dot_dimension_numbers<[1], [0], [0], [1], [0, 0, 1, 1], [], []>} : vector<8x8xf32>, vector<8x384xf32>, vector<8x384xf32> -> vector<8x384xf32>
    %106 = arith.addf %102, %105 : vector<8x384xf32>
    %c0_70 = arith.constant 0 : index
    %c8_71 = arith.constant 8 : index
    %107 = vector.load %arg4[%c0_70, %c8_71] : memref<8x76xf32, #tpu.memory_space<vmem>>, vector<8x8xf32>
    %c0_72 = arith.constant 0 : index
    %c104 = arith.constant 104 : index
    %108 = vector.load %arg9[%c0_72, %c104] : memref<8x537xf32, #tpu.memory_space<vmem>>, vector<8x384xf32>
    %cst_73 = arith.constant dense<0.000000e+00> : vector<8x384xf32>
    %109 = tpu.matmul %107, %108, %cst_73 {dimension_numbers = #tpu.dot_dimension_numbers<[1], [0], [0], [1], [0, 0, 1, 1], [], []>} : vector<8x8xf32>, vector<8x384xf32>, vector<8x384xf32> -> vector<8x384xf32>
    %110 = arith.addf %106, %109 : vector<8x384xf32>
    %c0_74 = arith.constant 0 : index
    %c16_75 = arith.constant 16 : index
    %111 = vector.load %arg4[%c0_74, %c16_75] : memref<8x76xf32, #tpu.memory_space<vmem>>, vector<8x8xf32>
    %c0_76 = arith.constant 0 : index
    %c105 = arith.constant 105 : index
    %112 = vector.load %arg9[%c0_76, %c105] : memref<8x537xf32, #tpu.memory_space<vmem>>, vector<8x384xf32>
    %cst_77 = arith.constant dense<0.000000e+00> : vector<8x384xf32>
    %113 = tpu.matmul %111, %112, %cst_77 {dimension_numbers = #tpu.dot_dimension_numbers<[1], [0], [0], [1], [0, 0, 1, 1], [], []>} : vector<8x8xf32>, vector<8x384xf32>, vector<8x384xf32> -> vector<8x384xf32>
    %114 = arith.addf %110, %113 : vector<8x384xf32>
    %c0_78 = arith.constant 0 : index
    %c24_79 = arith.constant 24 : index
    %115 = vector.load %arg4[%c0_78, %c24_79] : memref<8x76xf32, #tpu.memory_space<vmem>>, vector<8x8xf32>
    %c0_80 = arith.constant 0 : index
    %c127 = arith.constant 127 : index
    %116 = vector.load %arg9[%c0_80, %c127] : memref<8x537xf32, #tpu.memory_space<vmem>>, vector<8x384xf32>
    %cst_81 = arith.constant dense<0.000000e+00> : vector<8x384xf32>
    %117 = tpu.matmul %115, %116, %cst_81 {dimension_numbers = #tpu.dot_dimension_numbers<[1], [0], [0], [1], [0, 0, 1, 1], [], []>} : vector<8x8xf32>, vector<8x384xf32>, vector<8x384xf32> -> vector<8x384xf32>
    %118 = arith.addf %114, %117 : vector<8x384xf32>
    %c0_82 = arith.constant 0 : index
    %c32_83 = arith.constant 32 : index
    %119 = vector.load %arg4[%c0_82, %c32_83] : memref<8x76xf32, #tpu.memory_space<vmem>>, vector<8x8xf32>
    %c0_84 = arith.constant 0 : index
    %c128_85 = arith.constant 128 : index
    %120 = vector.load %arg9[%c0_84, %c128_85] : memref<8x537xf32, #tpu.memory_space<vmem>>, vector<8x384xf32>
    %cst_86 = arith.constant dense<0.000000e+00> : vector<8x384xf32>
    %121 = tpu.matmul %119, %120, %cst_86 {dimension_numbers = #tpu.dot_dimension_numbers<[1], [0], [0], [1], [0, 0, 1, 1], [], []>} : vector<8x8xf32>, vector<8x384xf32>, vector<8x384xf32> -> vector<8x384xf32>
    %122 = arith.addf %118, %121 : vector<8x384xf32>
    %c0_87 = arith.constant 0 : index
    %c40 = arith.constant 40 : index
    %123 = vector.load %arg4[%c0_87, %c40] : memref<8x76xf32, #tpu.memory_space<vmem>>, vector<8x8xf32>
    %c0_88 = arith.constant 0 : index
    %c129 = arith.constant 129 : index
    %124 = vector.load %arg9[%c0_88, %c129] : memref<8x537xf32, #tpu.memory_space<vmem>>, vector<8x384xf32>
    %cst_89 = arith.constant dense<0.000000e+00> : vector<8x384xf32>
    %125 = tpu.matmul %123, %124, %cst_89 {dimension_numbers = #tpu.dot_dimension_numbers<[1], [0], [0], [1], [0, 0, 1, 1], [], []>} : vector<8x8xf32>, vector<8x384xf32>, vector<8x384xf32> -> vector<8x384xf32>
    %126 = arith.addf %122, %125 : vector<8x384xf32>
    %c0_90 = arith.constant 0 : index
    %c48_91 = arith.constant 48 : index
    %127 = vector.load %arg4[%c0_90, %c48_91] : memref<8x76xf32, #tpu.memory_space<vmem>>, vector<8x8xf32>
    %c0_92 = arith.constant 0 : index
    %c151 = arith.constant 151 : index
    %128 = vector.load %arg9[%c0_92, %c151] : memref<8x537xf32, #tpu.memory_space<vmem>>, vector<8x384xf32>
    %cst_93 = arith.constant dense<0.000000e+00> : vector<8x384xf32>
    %129 = tpu.matmul %127, %128, %cst_93 {dimension_numbers = #tpu.dot_dimension_numbers<[1], [0], [0], [1], [0, 0, 1, 1], [], []>} : vector<8x8xf32>, vector<8x384xf32>, vector<8x384xf32> -> vector<8x384xf32>
    %130 = arith.addf %126, %129 : vector<8x384xf32>
    %c0_94 = arith.constant 0 : index
    %c56 = arith.constant 56 : index
    %131 = vector.load %arg4[%c0_94, %c56] : memref<8x76xf32, #tpu.memory_space<vmem>>, vector<8x8xf32>
    %c0_95 = arith.constant 0 : index
    %c152 = arith.constant 152 : index
    %132 = vector.load %arg9[%c0_95, %c152] : memref<8x537xf32, #tpu.memory_space<vmem>>, vector<8x384xf32>
    %cst_96 = arith.constant dense<0.000000e+00> : vector<8x384xf32>
    %133 = tpu.matmul %131, %132, %cst_96 {dimension_numbers = #tpu.dot_dimension_numbers<[1], [0], [0], [1], [0, 0, 1, 1], [], []>} : vector<8x8xf32>, vector<8x384xf32>, vector<8x384xf32> -> vector<8x384xf32>
    %134 = arith.addf %130, %133 : vector<8x384xf32>
    %c0_97 = arith.constant 0 : index
    %c64 = arith.constant 64 : index
    %135 = vector.load %arg4[%c0_97, %c64] : memref<8x76xf32, #tpu.memory_space<vmem>>, vector<8x8xf32>
    %c0_98 = arith.constant 0 : index
    %c153 = arith.constant 153 : index
    %136 = vector.load %arg9[%c0_98, %c153] : memref<8x537xf32, #tpu.memory_space<vmem>>, vector<8x384xf32>
    %cst_99 = arith.constant dense<0.000000e+00> : vector<8x384xf32>
    %137 = tpu.matmul %135, %136, %cst_99 {dimension_numbers = #tpu.dot_dimension_numbers<[1], [0], [0], [1], [0, 0, 1, 1], [], []>} : vector<8x8xf32>, vector<8x384xf32>, vector<8x384xf32> -> vector<8x384xf32>
    %138 = arith.addf %134, %137 : vector<8x384xf32>
    %c0_100 = arith.constant 0 : index
    %c0_101 = arith.constant 0 : index
    %139 = vector.load %arg6[%c0_100, %c0_101] : memref<8x1xf32, #tpu.memory_space<vmem>>, vector<8x1xf32>
    %140 = vector.broadcast %139 : vector<8x1xf32> to vector<8x384xf32>
    %141 = arith.addf %138, %140 : vector<8x384xf32>
    %c0_102 = arith.constant 0 : index
    %c72 = arith.constant 72 : index
    %142 = vector.load %arg4[%c0_102, %c72] : memref<8x76xf32, #tpu.memory_space<vmem>>, vector<8x4xf32>
    %c0_103 = arith.constant 0 : index
    %c25_104 = arith.constant 25 : index
    %143 = vector.load %arg8[%c0_103, %c25_104] : memref<4x456xf32, #tpu.memory_space<vmem>>, vector<4x384xf32>
    %cst_105 = arith.constant dense<0.000000e+00> : vector<8x384xf32>
    %144 = tpu.matmul %142, %143, %cst_105 {dimension_numbers = #tpu.dot_dimension_numbers<[1], [0], [0], [1], [0, 0, 1, 1], [], []>} : vector<8x4xf32>, vector<4x384xf32>, vector<8x384xf32> -> vector<8x384xf32>
    %145 = arith.addf %141, %144 : vector<8x384xf32>
    %cst_106 = arith.constant 0.000000e+00 : f32
    %146 = vector.broadcast %cst_106 : f32 to vector<8x384xf32>
    %147 = arith.maximumf %145, %146 : vector<8x384xf32>
    %c0_107 = arith.constant 0 : index
    %c0_108 = arith.constant 0 : index
    %c0_109 = arith.constant 0 : index
    %148 = vector.load %arg7[%c0_107, %c0_108, %c0_109] : memref<1x8x384xf32, #tpu.memory_space<vmem>>, vector<1x8x384xf32>
    %149 = vector.shape_cast %148 : vector<1x8x384xf32> to vector<8x384xf32>
    %150 = vector.shape_cast %147 : vector<8x384xf32> to vector<1x8x384xf32>
    tpu.vector_store %arg7[%c0_107, %c0_108, %c0_109], %150 {strides = array<i32>} : memref<1x8x384xf32, #tpu.memory_space<vmem>>, vector<1x8x384xf32>,
    return
  }
  func.func @transform_0(%arg0: i32) -> (i32, i32, i32, i32) {
    %c0_i32 = arith.constant 0 : i32
    %c0_i32_0 = arith.constant 0 : i32
    %c0_i32_1 = arith.constant 0 : i32
    %c0_i32_2 = arith.constant 0 : i32
    return %arg0, %c0_i32, %c0_i32_0, %c0_i32_1 : i32, i32, i32, i32
  }
  func.func @transform_1(%arg0: i32) -> (i32, i32) {
    %c0_i32 = arith.constant 0 : i32
    %c0_i32_0 = arith.constant 0 : i32
    %c0_i32_1 = arith.constant 0 : i32
    return %c0_i32, %c0_i32_0 : i32, i32
  }
  func.func @transform_2(%arg0: i32) -> (i32, i32) {
    %c0_i32 = arith.constant 0 : i32
    %c0_i32_0 = arith.constant 0 : i32
    %c0_i32_1 = arith.constant 0 : i32
    return %c0_i32, %c0_i32_0 : i32, i32
  }
  func.func @transform_3(%arg0: i32) -> (i32, i32) {
    %c0_i32 = arith.constant 0 : i32
    %c0_i32_0 = arith.constant 0 : i32
    %c0_i32_1 = arith.constant 0 : i32
    return %c0_i32, %c0_i32_0 : i32, i32
  }
  func.func @transform_4(%arg0: i32) -> (i32, i32) {
    %c0_i32 = arith.constant 0 : i32
    %c0_i32_0 = arith.constant 0 : i32
    %c0_i32_1 = arith.constant 0 : i32
    return %c0_i32, %c0_i32_0 : i32, i32
  }
  func.func @transform_5(%arg0: i32) -> (i32, i32) {
    %c0_i32 = arith.constant 0 : i32
    %c0_i32_0 = arith.constant 0 : i32
    %c0_i32_1 = arith.constant 0 : i32
    return %c0_i32, %c0_i32_0 : i32, i32
  }
  func.func @transform_6(%arg0: i32) -> (i32, i32, i32) {
    %c0_i32 = arith.constant 0 : i32
    %c0_i32_0 = arith.constant 0 : i32
    %c0_i32_1 = arith.constant 0 : i32
    return %arg0, %c0_i32, %c0_i32_0 : i32, i32, i32
  }
}

</mosaic_0001>

<bundles_post_ra>
// kernel: basic_block_forward.1
= control target key start
LH: loop header
LB: loop body
LE: loop exit
PB: predicated region body
PF: predicated region fallthrough
CT: control target
= control target key end

     0   :  { %s2701_s21 = smov 0   ;;  %s3244_s0 = inlined_call_operand.vmem [shape: f32[2,4,16,16], index: 0, kind: input, shape index: {}]   ;;  %s3245_s1 = inlined_call_operand.vmem [shape: f32[1,384], index: 1, kind: input, shape index: {}]   ;;  %s3246_s2 = inlined_call_operand.vmem [shape: f32[8,36], index: 2, kind: input, shape index: {}]   ;;  %s3247_s3 = inlined_call_operand.vmem [shape: f32[8,76], index: 3, kind: input, shape index: {}]   ;;  %s3248_s4 = inlined_call_operand.vmem [shape: f32[8,1], index: 4, kind: input, shape index: {}]   ;;  %s3249_s5 = inlined_call_operand.vmem [shape: f32[8,1], index: 5, kind: input, shape index: {}]   ;;  %s3250_s6 = inlined_call_operand.vmem [shape: f32[2,8,384], index: 6, kind: output, shape index: {}]  }
   0x1 LB: > { %s2391_s22 = sadd.s32 4294967295, %s2625_s21   ;;  %p2395_p0 = scmp.ge.s32.totalorder %s2625_s21, 1  ;;  %s2625_s21 = sphi %s2701_s21, %s16_s21  }
   0x2   : > { %p212_p1 = scmp.lt.s32.totalorder %s2625_s21, 3 }
   0x4   : > { %p213_p2 = pnand %p2395_p0, %p212_p1 }
   0x5   : > { %p242_p3 = scmp.lt.s32.totalorder (!%p213_p2), %s2391_s22, 1  ;;  %s2627_s27 = smov (!%p213_p2), 25  }
   0x6   : > { %216 = sbr.rel (%p213_p2) target bundleno = 864 (0x360), region = 44  ;;  %s2628_s28 = smov (!%p213_p2), 73  }
   0x7   : > { %s2629_s29 = smov (!%p213_p2), 49   ;;  %s2630_s30 = smov (!%p213_p2), 113  }
   0x8   : > { %s2631_s7 = smov (!%p213_p2), 97   ;;  %s2632_s8 = smov (!%p213_p2), 89  }
   0x9   : > { %s2633_s9 = smov (!%p213_p2), 121   ;;  %s2634_s10 = smov (!%p213_p2), 33  }
   0xa   : > { %s2635_s11 = smov (!%p213_p2), 9   ;;  %s2636_s12 = smov (!%p213_p2), 41  }
   0xb   : > { %s3252_s22 = smov (!%p242_p3, %s2391_s22), 1  ;;  %vm271_vm0 = vcmask 1041409   ;;  %vm273_vm1 = vcmask 1045509   ;;  %vm276_vm2 = vcmask 1042434   ;;  %vm278_vm3 = vcmask 1046534   ;;  %s2637_s13 = smov 17  }
   0xc   : > { %s2488_s23 = sshll.u32 %s3252_s22, 6  ;;  %vm281_vm4 = vcmask 1043459   ;;  %vm283_vm5 = vcmask 1047559   ;;  %s2638_s14 = smov 65   ;;  %vm1491_vm6 = vcmask 203776   ;;  %vm254_vm7 = vcmask 1043456  }
   0xd   : > { %s2715_s26 = scalar_lea.vmem %s3244_s0, %s2488_s23  ;;  %s2640_s15 = smov 57   ;;  %vm255_vm8 = vcmask 588804   ;;  %vm288_vm10 = vcmask 330952   ;;  %vm302_vm11 = vcmask 527752   ;;  %vm316_vm12 = vcmask 724552  }
   0xe   : > { %v2718_v0 = vld [vmem:[%s2715_s26] sm:$0xff]  ;;  %v2721_v1 = vld [vmem:[%s2715_s26 + $0x10] sm:$0xff]  ;;  %v2747_v16 = vld [vmem:[%s2715_s26 + $0x8] sm:$0xff]  ;;  %s2641_s16 = smov 81   ;;  %s2642_s17 = smov 105   ;;  %vm330_vm13 = vcmask 921352  }
   0xf   : > { %v2724_v2 = vld [vmem:[%s2715_s26 + $0x20] sm:$0xff]  ;;  %v2727_v3 = vld [vmem:[%s2715_s26 + $0x30] sm:$0xff]  ;;  %v270_v4 = vrot.slane %v2721_v1, 7  ;;  %332 = vst.sshfl [vmem:[#allocation1] sm:$0xff pattern:$0x75316420] %v2718_v0  ;;  %vm256_vm9 = vmor %vm255_vm8, %vm254_vm7 }
  0x10   : > { %v275_v5 = vrot.slane %v2724_v2, 6  ;;  %v280_v6 = vrot.slane %v2727_v3, 5  ;;  %335 = vst.sshfl [vmem:[#allocation1 + $0x10] sm:$0xff pattern:$0x75316420] %v2721_v1  ;;  %v304_v7 = vrot.slane %v2718_v0, 2 }
  0x11   : > { %v305_v8 = vrot.slane %v2721_v1, 1  ;;  %v272_v9 = vsel %vm271_vm0, %v270_v4, %v2718_v0  ;;  %338 = vst.sshfl [vmem:[#allocation1 + $0x20] sm:$0xff pattern:$0x75316420] %v2724_v2  ;;  %v310_v10 = vrot.slane %v2727_v3, 7  ;;  %v290_v11 = vrot.slane %v2718_v0, 1 }
  0x12   : > { %v293_v12 = vrot.slane %v2724_v2, 7  ;;  %v274_v13 = vsel %vm273_vm1, %v270_v4, %v272_v9  ;;  %341 = vst.sshfl [vmem:[#allocation1 + $0x30] sm:$0xff pattern:$0x75316420] %v2727_v3  ;;  %v296_v15 = vrot.slane %v2727_v3, 6  ;;  %v2750_v17 = vld [vmem:[%s2715_s26 + $0x18] sm:$0xff] }
  0x13   : > { %v306_v14 = vsel %vm271_vm0, %v305_v8, %v304_v7  ;;  %v277_v18 = vsel %vm276_vm2, %v275_v5, %v274_v13  ;;  %v291_v20 = vsel %vm271_vm0, %v2721_v1, %v290_v11  ;;  %v2757_v21 = vld [vmem:[%s2715_s26 + $0x28] sm:$0xff]  ;;  %v459_v22 = vrot.slane %v2747_v16, 1  ;;  %v2766_v26 = vld [vmem:[%s2715_s26 + $0x38] sm:$0xff]  ;;  %s2643_s18 = smov 1   ;;  %s2644_s23 = smov 120  }
  0x14   : > { %v307_v19 = vsel %vm273_vm1, %v305_v8, %v306_v14  ;;  %v279_v23 = vsel %vm278_vm3, %v275_v5, %v277_v18  ;;  %v292_v25 = vsel %vm273_vm1, %v2721_v1, %v291_v20  ;;  %v462_v27 = vrot.slane %v2757_v21, 7  ;;  %s2645_s24 = smov 116   ;;  %s2646_s25 = smov 124  }
  0x15   : > { %v308_v24 = vsel %vm276_vm2, %v2724_v2, %v307_v19  ;;  %v282_v28 = vsel %vm281_vm4, %v280_v6, %v279_v23  ;;  %v294_v30 = vsel %vm276_vm2, %v293_v12, %v292_v25  ;;  %v460_v31 = vsel %vm271_vm0, %v2750_v17, %v459_v22  ;;  %s2647_s26 = smov 108  }
  0x16   : > { %v309_v29 = vsel %vm278_vm3, %v2724_v2, %v308_v24  ;;  %v284_v32 = vsel %vm283_vm5, %v280_v6, %v282_v28  ;;  %v295_v34 = vsel %vm278_vm3, %v293_v12, %v294_v30  ;;  %v461_v35 = vsel %vm273_vm1, %v2750_v17, %v460_v31  ;;  %v334_v36 = vld [vmem:[#allocation1 + $0x1] ss:$2 sm:$0xff] }
  0x17   : > { %v311_v33 = vsel %vm281_vm4, %v310_v10, %v309_v29  ;;  %285 = vrot.lane.b32.xlu0 %v284_v32, %s2627_s27  ;;  %v297_v38 = vsel %vm281_vm4, %v296_v15, %v295_v34  ;;  %v463_v39 = vsel %vm276_vm2, %v462_v27, %v461_v35  ;;  %v465_v40 = vrot.slane %v2766_v26, 6  ;;  %v337_v41 = vld [vmem:[#allocation1 + $0x11] ss:$2 sm:$0xff]  ;;  %363 = vst.sshfl [vmem:[#allocation1] sm:$0xff pattern:$0x75316420] %v2718_v0 }
  0x18   : > { %v312_v37 = vsel %vm283_vm5, %v310_v10, %v311_v33  ;;  %v464_v42 = vsel %vm278_vm3, %v462_v27, %v463_v39  ;;  %v445_v43 = vrot.slane %v2750_v17, 7  ;;  %v448_v44 = vrot.slane %v2757_v21, 6  ;;  %v340_v45 = vld [vmem:[#allocation1 + $0x21] ss:$2 sm:$0xff] }
  0x19   : > { %313 = vrot.lane.b32.xlu1 %v312_v37, %s2628_s28  ;;  %v298_v46 = vsel %vm283_vm5, %v296_v15, %v297_v38  ;;  %v343_v47 = vld [vmem:[#allocation1 + $0x31] ss:$2 sm:$0xff]  ;;  %v344_v48 = vrot.slane %v337_v41, 7  ;;  %v347_v49 = vrot.slane %v340_v45, 6  ;;  %v466_v50 = vsel %vm281_vm4, %v465_v40, %v464_v42  ;;  %s2648_s28 = smov 104  }
  0x1a   : > { %v446_v51 = vsel %vm271_vm0, %v445_v43, %v2747_v16  ;;  %v451_v52 = vrot.slane %v2766_v26, 5  ;;  %366 = vst.sshfl [vmem:[#allocation1 + $0x10] sm:$0xff pattern:$0x75316420] %v2721_v1  ;;  %v318_v53 = vrot.slane %v2718_v0, 3  ;;  %v319_v56 = vrot.slane %v2721_v1, 2 }
  0x1b   : > { %v447_v54 = vsel %vm273_vm1, %v445_v43, %v446_v51  ;;  %v345_v55 = vsel %vm271_vm0, %v344_v48, %v334_v36  ;;  %369 = vst.sshfl [vmem:[#allocation1 + $0x20] sm:$0xff pattern:$0x75316420] %v2724_v2  ;;  %v322_v57 = vrot.slane %v2724_v2, 1  ;;  %v478_v60 = vrot.slane %v2747_v16, 2 }
  0x1c   : > { %v449_v58 = vsel %vm276_vm2, %v448_v44, %v447_v54  ;;  %v346_v59 = vsel %vm273_vm1, %v344_v48, %v345_v55  ;;  %372 = vst.sshfl [vmem:[#allocation1 + $0x30] sm:$0xff pattern:$0x75316420] %v2727_v3  ;;  %v479_v61 = vrot.slane %v2750_v17, 1  ;;  %v467_v62 = vsel %vm283_vm5, %v465_v40, %v466_v50 }
  0x1d   : > { %v450_v63 = vsel %vm278_vm3, %v448_v44, %v449_v58  ;;  %v348_v4 = vsel %vm276_vm2, %v347_v49, %v346_v59  ;;  %v320_v5 = vsel %vm271_vm0, %v319_v56, %v318_v53  ;;  %v350_v6 = vrot.slane %v343_v47, 5 }
  0x1e   : > { %v365_v7 = vld [vmem:[#allocation1 + $0x1] ss:$2 sm:$0xff]  ;;  %v321_v8 = vsel %vm273_vm1, %v319_v56, %v320_v5  ;;  %v480_v9 = vsel %vm271_vm0, %v479_v61, %v478_v60  ;;  %v349_v10 = vsel %vm278_vm3, %v347_v49, %v348_v4  ;;  %v492_v12 = vrot.slane %v2747_v16, 3 }
  0x1f   : > { %299 = vrot.lane.b32.xlu0 %v298_v46, %s2629_s29  ;;  %389 = vst.sshfl [vmem:[#allocation1] sm:$0xff pattern:$0x75316420] %v2718_v0  ;;  %v323_v11 = vsel %vm276_vm2, %v322_v57, %v321_v8  ;;  %v452_v13 = vsel %vm281_vm4, %v451_v52, %v450_v63  ;;  %v493_v15 = vrot.slane %v2750_v17, 2  ;;  %v481_v20 = vsel %vm273_vm1, %v479_v61, %v480_v9  ;;  %s2649_s29 = smov 112  }
  0x20   : > { %v324_v14 = vsel %vm278_vm3, %v322_v57, %v323_v11  ;;  %v496_v22 = vrot.slane %v2757_v21, 1  ;;  %v375_v23 = vrot.slane %v365_v7, 1  ;;  %v351_v24 = vsel %vm281_vm4, %v350_v6, %v349_v10 }
  0x21   : > { %468 = vrot.lane.b32.xlu1 %v467_v62, %s2630_s30  ;;  %v368_v18 = vld [vmem:[#allocation1 + $0x11] ss:$2 sm:$0xff]  ;;  %v325_v19 = vsel %vm281_vm4, %v2727_v3, %v324_v14  ;;  %v494_v28 = vsel %vm271_vm0, %v493_v15, %v492_v12  ;;  %v453_v33 = vsel %vm283_vm5, %v451_v52, %v452_v13  ;;  %v482_v34 = vsel %vm276_vm2, %v2757_v21, %v481_v20  ;;  %s2650_s30 = smov 100  }
  0x22   : > { %v371_v25 = vld [vmem:[#allocation1 + $0x21] ss:$2 sm:$0xff]  ;;  %392 = vst.sshfl [vmem:[#allocation1 + $0x10] sm:$0xff pattern:$0x75316420] %v2721_v1  ;;  %v326_v27 = vsel %vm283_vm5, %v2727_v3, %v325_v19  ;;  %v495_v30 = vsel %vm273_vm1, %v493_v15, %v494_v28  ;;  %v376_v31 = vsel %vm271_vm0, %v368_v18, %v375_v23  ;;  %v352_v37 = vsel %vm283_vm5, %v350_v6, %v351_v24 }
  0x23   : > { %v374_v29 = vld [vmem:[#allocation1 + $0x31] ss:$2 sm:$0xff]  ;;  %395 = vst.sshfl [vmem:[#allocation1 + $0x20] sm:$0xff pattern:$0x75316420] %v2724_v2  ;;  %327 = vrot.lane.b32.xlu2 %v326_v27, %s2631_s7  ;;  %v378_v32 = vrot.slane %v371_v25, 7  ;;  %v497_v35 = vsel %vm276_vm2, %v496_v22, %v495_v30  ;;  %v377_v36 = vsel %vm273_vm1, %v368_v18, %v376_v31  ;;  %v483_v42 = vsel %vm278_vm3, %v2757_v21, %v482_v34 }
  0x24   : > { %398 = vst.sshfl [vmem:[#allocation1 + $0x30] sm:$0xff pattern:$0x75316420] %v2727_v3  ;;  %v498_v38 = vsel %vm278_vm3, %v496_v22, %v497_v35  ;;  %v484_v40 = vrot.slane %v2766_v26, 7  ;;  %v381_v47 = vrot.slane %v374_v29, 6  ;;  %v2639_v24 = vmov 0.0  }
  0x25   : > { %v499_v41 = vsel %vm281_vm4, %v2766_v26, %v498_v38  ;;  %v379_v43 = vsel %vm276_vm2, %v378_v32, %v377_v36  ;;  %253 = vst [vmem:[#allocation2] sm:$0xff] %v2639_v24  ;;  %vm359_vm14 = vcmask 1044424   ;;  %vm360_vm15 = vcmask 72708   ;;  %s2651_s7 = smov 127  }
  0x26   : > { %v391_v39 = vld [vmem:[#allocation1 + $0x1] ss:$2 sm:$0xff]  ;;  %v500_v45 = vsel %vm283_vm5, %v2766_v26, %v499_v41  ;;  %v485_v50 = vsel %vm281_vm4, %v484_v40, %v483_v42  ;;  %1492 = vst.msk [vmem:[#allocation3 + $0x20] sm:$0xff] %vm1491_vm6, %v2639_v24  ;;  %vm439_vm8 = vcmask 658952  }
  0x27   : > { %454 = vrot.lane.b32.xlu0 %v453_v33, %s2632_s8  ;;  %415 = vst.sshfl [vmem:[#allocation1] sm:$0xff pattern:$0x75316420] %v2718_v0  ;;  %v401_v44 = vrot.slane %v391_v39, 2  ;;  %v380_v0 = vsel %vm278_vm3, %v378_v32, %v379_v43  ;;  %v486_v55 = vsel %vm283_vm5, %v484_v40, %v485_v50  ;;  %s2652_s8 = smov 126  }
  0x28   : > { %257 = vst.msk [vmem:[#allocation2 + $0x8] sm:$0xff] %vm256_vm9, %v2639_v24  ;;  %vm471_vm9 = vcmask 924672  }
  0x29   : > { %353 = vrot.lane.b32.xlu1 %v352_v37, %s2633_s9  ;;  %v394_v46 = vld [vmem:[#allocation1 + $0x11] ss:$2 sm:$0xff]  ;;  %s2653_s9 = smov 103  }
  0x2a   : > { %v397_v48 = vld [vmem:[#allocation1 + $0x21] ss:$2 sm:$0xff]  ;;  %v402_v49 = vrot.slane %v394_v46, 1  ;;  %418 = vst.sshfl [vmem:[#allocation1 + $0x10] sm:$0xff pattern:$0x75316420] %v2721_v1  ;;  %v382_v1 = vsel %vm281_vm4, %v381_v47, %v380_v0 }
  0x2b   : > { %v400_v51 = vld [vmem:[#allocation1 + $0x31] ss:$2 sm:$0xff]  ;;  %421 = vst.sshfl [vmem:[#allocation1 + $0x20] sm:$0xff pattern:$0x75316420] %v2724_v2  ;;  %501 = vrot.lane.b32.xlu2 %v500_v45, %s2634_s10  ;;  %v383_v59 = vsel %vm283_vm5, %v381_v47, %v382_v1  ;;  %s2654_s10 = smov 102  }
  0x2c   : > { %v403_v52 = vsel %vm271_vm0, %v402_v49, %v401_v44  ;;  %v407_v53 = vrot.slane %v400_v51, 7  ;;  %424 = vst.sshfl [vmem:[#allocation1 + $0x30] sm:$0xff pattern:$0x75316420] %v2727_v3 }
  0x2d   : > { %v404_v54 = vsel %vm273_vm1, %v402_v49, %v403_v52 }
  0x2e   : > { %v405_v56 = vsel %vm276_vm2, %v397_v48, %v404_v54  ;;  %v417_v57 = vld [vmem:[#allocation1 + $0x1] ss:$2 sm:$0xff] }
  0x2f   : > { %v406_v58 = vsel %vm278_vm3, %v397_v48, %v405_v56  ;;  %506 = vst.sshfl [vmem:[#allocation1] sm:$0xff pattern:$0x75316420] %v2747_v16  ;;  %v427_v3 = vrot.slane %v417_v57, 3 }
  0x30   : > { %v408_v2 = vsel %vm281_vm4, %v407_v53, %v406_v58 }
  0x31   : > { %487 = vrot.lane.b32.xlu1 %v486_v55, %s2635_s11  ;;  %v409_v60 = vsel %vm283_vm5, %v407_v53, %v408_v2  ;;  %v420_v61 = vld [vmem:[#allocation1 + $0x11] ss:$2 sm:$0xff]  ;;  %s2655_s11 = smov 80  }
  0x32   : > { %410 = vrot.lane.b32.xlu0 %v409_v60, %s2636_s12  ;;  %v423_v62 = vld [vmem:[#allocation1 + $0x21] ss:$2 sm:$0xff]  ;;  %v428_v63 = vrot.slane %v420_v61, 2  ;;  %509 = vst.sshfl [vmem:[#allocation1 + $0x10] sm:$0xff pattern:$0x75316420] %v2750_v17 }
  0x33   : > { %384 = vrot.lane.b32.xlu2 %v383_v59, %s2637_s13  ;;  %v426_v4 = vld [vmem:[#allocation1 + $0x31] ss:$2 sm:$0xff]  ;;  %v431_v5 = vrot.slane %v423_v62, 1  ;;  %512 = vst.sshfl [vmem:[#allocation1 + $0x20] sm:$0xff pattern:$0x75316420] %v2757_v21 }
  0x34   : > { %v429_v6 = vsel %vm271_vm0, %v428_v63, %v427_v3  ;;  %515 = vst.sshfl [vmem:[#allocation1 + $0x30] sm:$0xff pattern:$0x75316420] %v2766_v26  ;;  %v2918_v62 = vld [vmem:[%s3246_s2] sm:$0xff]  ;;  %s2656_s12 = smov 79   ;;  %s2657_s13 = smov 78  }
  0x35   : > { %v430_v7 = vsel %vm273_vm1, %v428_v63, %v429_v6 }
  0x36   : > { %v432_v8 = vsel %vm276_vm2, %v431_v5, %v430_v7  ;;  %v508_v9 = vld [vmem:[#allocation1 + $0x1] ss:$2 sm:$0xff] }
  0x37   : > { %v433_v10 = vsel %vm278_vm3, %v431_v5, %v432_v8  ;;  %532 = vst.sshfl [vmem:[#allocation1] sm:$0xff pattern:$0x75316420] %v2747_v16 }
  0x38   : > { %v434_v11 = vsel %vm281_vm4, %v426_v4, %v433_v10 }
  0x39   : > { %v435_v12 = vsel %vm283_vm5, %v426_v4, %v434_v11  ;;  %v511_v13 = vld [vmem:[#allocation1 + $0x11] ss:$2 sm:$0xff] }
  0x3a   : > { %v514_v14 = vld [vmem:[#allocation1 + $0x21] ss:$2 sm:$0xff]  ;;  %v518_v15 = vrot.slane %v511_v13, 7  ;;  %535 = vst.sshfl [vmem:[#allocation1 + $0x10] sm:$0xff pattern:$0x75316420] %v2750_v17 }
  0x3b   : > { %436 = vrot.lane.b32.xlu2 %v435_v12, %s2638_s14  ;;  %v517_v18 = vld [vmem:[#allocation1 + $0x31] ss:$2 sm:$0xff]  ;;  %v521_v19 = vrot.slane %v514_v14, 6  ;;  %538 = vst.sshfl [vmem:[#allocation1 + $0x20] sm:$0xff pattern:$0x75316420] %v2757_v21 }
  0x3c   : > { %v519_v20 = vsel %vm271_vm0, %v518_v15, %v508_v9  ;;  %v524_v22 = vrot.slane %v517_v18, 5  ;;  %541 = vst.sshfl [vmem:[#allocation1 + $0x30] sm:$0xff pattern:$0x75316420] %v2766_v26  ;;  %s2658_s14 = smov 96  }
  0x3d   : > { %v520_v23 = vsel %vm273_vm1, %v518_v15, %v519_v20 }
  0x3e   : > { %v522_v25 = vsel %vm276_vm2, %v521_v19, %v520_v23  ;;  %v534_v27 = vld [vmem:[#allocation1 + $0x1] ss:$2 sm:$0xff] }
  0x3f   : > { %v523_v28 = vsel %vm278_vm3, %v521_v19, %v522_v25  ;;  %v544_v29 = vrot.slane %v534_v27, 1  ;;  %558 = vst.sshfl [vmem:[#allocation1] sm:$0xff pattern:$0x75316420] %v2747_v16 }
  0x40   : > { %v525_v30 = vsel %vm281_vm4, %v524_v22, %v523_v28 }
  0x41   : > { %v526_v31 = vsel %vm283_vm5, %v524_v22, %v525_v30  ;;  %v537_v32 = vld [vmem:[#allocation1 + $0x11] ss:$2 sm:$0xff] }
  0x42   : > { %527 = vrot.lane.b32.xlu0 %v526_v31, %s2640_s15  ;;  %v540_v33 = vld [vmem:[#allocation1 + $0x21] ss:$2 sm:$0xff]  ;;  %v545_v34 = vsel %vm271_vm0, %v537_v32, %v544_v29  ;;  %561 = vst.sshfl [vmem:[#allocation1 + $0x10] sm:$0xff pattern:$0x75316420] %v2750_v17 }
  0x43   : > { %v543_v35 = vld [vmem:[#allocation1 + $0x31] ss:$2 sm:$0xff]  ;;  %v546_v36 = vsel %vm273_vm1, %v537_v32, %v545_v34  ;;  %v547_v37 = vrot.slane %v540_v33, 7  ;;  %564 = vst.sshfl [vmem:[#allocation1 + $0x20] sm:$0xff pattern:$0x75316420] %v2757_v21 }
  0x44   : > { %v550_v38 = vrot.slane %v543_v35, 6  ;;  %567 = vst.sshfl [vmem:[#allocation1 + $0x30] sm:$0xff pattern:$0x75316420] %v2766_v26 }
  0x45   : > { %v548_v39 = vsel %vm276_vm2, %v547_v37, %v546_v36 }
  0x46   : > { %v549_v40 = vsel %vm278_vm3, %v547_v37, %v548_v39  ;;  %v560_v41 = vld [vmem:[#allocation1 + $0x1] ss:$2 sm:$0xff] }
  0x47   : > { %v551_v42 = vsel %vm281_vm4, %v550_v38, %v549_v40  ;;  %584 = vst.sshfl [vmem:[#allocation1] sm:$0xff pattern:$0x75316420] %v2747_v16  ;;  %v570_v44 = vrot.slane %v560_v41, 2 }
  0x48   : > { %v552_v43 = vsel %vm283_vm5, %v550_v38, %v551_v42 }
  0x49   : > { %v563_v45 = vld [vmem:[#allocation1 + $0x11] ss:$2 sm:$0xff]  ;;  %553 = vrot.lane.b32.xlu1 %v552_v43, %s2641_s16 }
  0x4a   : > { %v566_v46 = vld [vmem:[#allocation1 + $0x21] ss:$2 sm:$0xff]  ;;  %587 = vst.sshfl [vmem:[#allocation1 + $0x10] sm:$0xff pattern:$0x75316420] %v2750_v17  ;;  %v571_v47 = vrot.slane %v563_v45, 1 }
  0x4b   : > { %v569_v48 = vld [vmem:[#allocation1 + $0x31] ss:$2 sm:$0xff]  ;;  %590 = vst.sshfl [vmem:[#allocation1 + $0x20] sm:$0xff pattern:$0x75316420] %v2757_v21 }
  0x4c   : > { %593 = vst.sshfl [vmem:[#allocation1 + $0x30] sm:$0xff pattern:$0x75316420] %v2766_v26  ;;  %v572_v49 = vsel %vm271_vm0, %v571_v47, %v570_v44  ;;  %v576_v50 = vrot.slane %v569_v48, 7 }
  0x4d   : > { %v573_v16 = vsel %vm273_vm1, %v571_v47, %v572_v49 }
  0x4e   : > { %v586_v0 = vld [vmem:[#allocation1 + $0x1] ss:$2 sm:$0xff]  ;;  %v574_v51 = vsel %vm276_vm2, %v566_v46, %v573_v16 }
  0x4f   : > { %v575_v52 = vsel %vm278_vm3, %v566_v46, %v574_v51  ;;  %v596_v53 = vrot.slane %v586_v0, 3 }
  0x50   : > { %v577_v54 = vsel %vm281_vm4, %v576_v50, %v575_v52 }
  0x51   : > { %v589_v17 = vld [vmem:[#allocation1 + $0x11] ss:$2 sm:$0xff]  ;;  %v578_v55 = vsel %vm283_vm5, %v576_v50, %v577_v54  ;;  %884 = vrot.lane.b32.xlu1 %v2918_v62, %s2645_s24 }
  0x52   : > { %v592_v1 = vld [vmem:[#allocation1 + $0x21] ss:$2 sm:$0xff]  ;;  %v597_v21 = vrot.slane %v589_v17, 2  ;;  %579 = vrot.lane.b32.xlu2 %v578_v55, %s2642_s17 }
  0x53   : > { %v600_v26 = vrot.slane %v592_v1, 1  ;;  %v595_v57 = vld [vmem:[#allocation1 + $0x31] ss:$2 sm:$0xff] }
  0x54   : > { %v598_v56 = vsel %vm271_vm0, %v597_v21, %v596_v53  ;;  %vm356_vm0 = vcmask 990208  }
  0x55   : > { %v599_v58 = vsel %vm273_vm1, %v597_v21, %v598_v56  ;;  %vm361_vm1 = vmor %vm360_vm15, %vm359_vm14  ;;  %vm530_vm14 = vcmask 593352   ;;  %vm556_vm15 = vcmask 790152  }
  0x56   : > { %v601_v2 = vsel %vm276_vm2, %v600_v26, %v599_v58  ;;  %vm387_vm2 = vcmask 265352  }
  0x57   : > { %v602_v59 = vsel %vm278_vm3, %v600_v26, %v601_v2  ;;  %vm413_vm3 = vcmask 462152  }
  0x58   : > { %v603_v3 = vsel %vm281_vm4, %v595_v57, %v602_v59  ;;  %vm474_vm4 = vcmask 1044360  }
  0x59   : > { %v604_v60 = vsel %vm283_vm5, %v595_v57, %v603_v3  ;;  %1178 = vrot.lane.b32.xlu1 %v2918_v62, %s2648_s28  ;;  %vm475_vm5 = vcmask 7172  }
  0x5a   : > { %605 = vrot.lane.b32.xlu0 %v604_v60, %s2643_s18  ;;  %786 = vrot.lane.b32.xlu2 %v2918_v62, %s2644_s23 }
  0x62   : > { %615 = vrot.lane.b32.xlu0 %v2918_v62, %s2646_s25  ;;  %1080 = vrot.lane.b32.xlu2 %v2918_v62, %s2647_s26  ;;  %s2660_s25 = smov 24   ;;  %s2661_s26 = smov 23  }
  0x6a   : > { %982 = vrot.lane.b32.xlu0 %v2918_v62, %s2649_s29 }
  0x72   : > { %1276 = vrot.lane.b32.xlu0 %v2918_v62, %s2650_s30 }
  0x7d   : > { %v328_v61 = vpop.permute.xlu2 %327 }
  0x85   : > { %v502_v5 = vpop.permute.xlu2 %501 }
  0x89   : > { %v286_v63 = vpop.permute.xlu0 %285 }
  0x8a   : > { %289 = vst.msk [vmem:[#allocation2] sm:$0xf] %vm288_vm10, %v286_v63  ;;  %vm457_vm10 = vcmask 855752  }
  0x8b   : > { %v314_v4 = vpop.permute.xlu1 %313 }
  0x8d   : > { %v385_v8 = vpop.permute.xlu2 %384 }
  0x91   : > { %v300_v6 = vpop.permute.xlu0 %299 }
  0x92   : > { %303 = vst.msk [vmem:[#allocation2] sm:$0xf] %vm302_vm11, %v300_v6  ;;  %vm476_vm11 = vmor %vm475_vm5, %vm474_vm4  ;;  %vm805_vm4 = vcmask 1031168   ;;  %vm903_vm5 = vcmask 850944  }
  0x93   : > { %v469_v7 = vpop.permute.xlu1 %468  ;;  %317 = vst.msk [vmem:[#allocation2] sm:$0xf] %vm316_vm12, %v314_v4  ;;  %vm490_vm12 = vcmask 199752  }
  0x94   : > { %331 = vst.msk [vmem:[#allocation2] sm:$0xf] %vm330_vm13, %v328_v61  ;;  %v470_v13 = vrot.slane %v469_v7, 4  ;;  %vm504_vm13 = vcmask 396552  }
  0x95   : > { %v437_v14 = vpop.permute.xlu2 %436 }
  0x96   : > { %v472_v19 = vsel %vm471_vm9, %v470_v13, %v469_v7  ;;  %vm1099_vm9 = vcmask 834560  }
  0x99   : > { %v455_v9 = vpop.permute.xlu0 %454 }
  0x9b   : > { %v354_v10 = vpop.permute.xlu1 %353 }
  0x9c   : > { %v355_v11 = vrot.slane %v354_v10, 4 }
  0x9e   : > { %v357_v12 = vsel %vm356_vm0, %v355_v11, %v354_v10  ;;  %vm582_vm0 = vcmask 986952  }
  0x9f   : > { %362 = vst.msk [vmem:[#allocation2] sm:$0xff] %vm361_vm1, %v357_v12  ;;  %vm608_vm1 = vcmask 134152  }
  0xa0   : > { %388 = vst.msk [vmem:[#allocation2 + $0x4] sm:$0xf] %vm387_vm2, %v385_v8  ;;  %vm638_vm2 = vcmask 31744  }
  0xa3   : > { %v488_v18 = vpop.permute.xlu1 %487 }
  0xa4   : > { %v411_v15 = vpop.permute.xlu0 %410 }
  0xa5   : > { %414 = vst.msk [vmem:[#allocation2 + $0x4] sm:$0xf] %vm413_vm3, %v411_v15  ;;  %vm634_vm3 = vcmask 1039360  }
  0xa6   : > { %440 = vst.msk [vmem:[#allocation2 + $0x4] sm:$0xf] %vm439_vm8, %v437_v14  ;;  %vm1001_vm8 = vcmask 842752  }
  0xa7   : > { %458 = vst.msk [vmem:[#allocation2 + $0x4] sm:$0xf] %vm457_vm10, %v455_v9  ;;  %vm1197_vm10 = vcmask 654336  }
  0xa8   : > { %477 = vst.msk [vmem:[#allocation2 + $0x4] sm:$0xff] %vm476_vm11, %v472_v19  ;;  %vm1295_vm11 = vcmask 646144  }
  0xa9   : > { %491 = vst.msk [vmem:[#allocation2 + $0x8] sm:$0xf] %vm490_vm12, %v488_v18  ;;  %vm1393_vm12 = vcmask 637952  }
  0xaa   : > { %505 = vst.msk [vmem:[#allocation2 + $0x8] sm:$0xf] %vm504_vm13, %v502_v5  ;;  %vm1516_vm13 = vcmask 195584  }
  0xac   : > { %v580_v27 = vpop.permute.xlu2 %579 }
  0xaf   : > { %v2930_v20 = vld [vmem:[#allocation2] sm:$0xff] }
  0xb0   : > { %619 = vst [vmem:[#allocation1] ss:$2 sm:$0xff] %v2930_v20 }
  0xb4   : > { %v528_v22 = vpop.permute.xlu0 %527  ;;  %v2980_v26 = vpop.permute.xlu2 %786 }
  0xb5   : > { %531 = vst.msk [vmem:[#allocation2 + $0x8] sm:$0xf] %vm530_vm14, %v528_v22  ;;  %vm1523_vm14 = vcmask 64512  }
  0xb7   : > { %v623_v23 = vld.sshfl [vmem:[#allocation1 + $0x8] sm:$0xff pattern:$0x75316420]  ;;  %v622_v25 = vld.sshfl [vmem:[#allocation1] sm:$0xff pattern:$0x75316420] }
  0xb8   : > { %628 = vrot.lane.b32.xlu2 %v623_v23, %s2651_s7  ;;  %626 = vrot.lane.b32.xlu1 %v622_v25, %s2651_s7  ;;  %708 = vst [vmem:[#allocation1] ss:$2 sm:$0xff] %v2930_v20 }
  0xbb   : > { %v554_v28 = vpop.permute.xlu1 %553 }
  0xbc   : > { %557 = vst.msk [vmem:[#allocation2 + $0x8] sm:$0xf] %vm556_vm15, %v554_v28  ;;  %v2989_v2 = vpop.permute.xlu2 %1080  ;;  %vm1672_vm15 = vcmask 187392  }
  0xbd   : > { %583 = vst.msk [vmem:[#allocation2 + $0x8] sm:$0xf] %vm582_vm0, %v580_v27  ;;  %vm1754_vm0 = vcmask 7168  }
  0xbf   : > { %v711_v29 = vld.sshfl [vmem:[#allocation1] sm:$0xff pattern:$0x75316420]  ;;  %v2936_v30 = vld.sshfl [vmem:[#allocation1 + $0x8] sm:$0xff pattern:$0x75316420] }
  0xc0   : > { %2405 = vmatpush.msk.msra.mxu3 %vm254_vm7, %v711_v29  ;;  %790 = vst [vmem:[#allocation1] ss:$2 sm:$0xff] %v2930_v20 }
  0xc1   : > { %2406 = vmatmul.msk.f32.vlgmr.msra.gmra.mxu3 %vm638_vm2, %v2918_v62 }
  0xc3   : > { %v2987_v58 = vpop.permute.xlu1 %884 }
  0xc4   : > { %v612_v39 = vld [vmem:[#allocation2 + $0x8] sm:$0xf] }
  0xc7   : > { %v794_v31 = vld.sshfl [vmem:[#allocation1 + $0x8] sm:$0xff pattern:$0x75316420]  ;;  %v793_v32 = vld.sshfl [vmem:[#allocation1] sm:$0xff pattern:$0x75316420] }
  0xc8   : > { %799 = vrot.lane.b32.xlu1 %v794_v31, %s2652_s8  ;;  %797 = vrot.lane.b32.xlu0 %v793_v32, %s2652_s8  ;;  %888 = vst [vmem:[#allocation1] ss:$2 sm:$0xff] %v2930_v20 }
  0xcb   : > { %v2995_v60 = vpop.permute.xlu1 %1178 }
  0xcc   : > { %v606_v33 = vpop.permute.xlu0 %605 }
  0xcd   : > { %609 = vst.msk [vmem:[#allocation2 + $0xc] sm:$0xf] %vm608_vm1, %v606_v33 }
  0xcf   : > { %v892_v34 = vld.sshfl [vmem:[#allocation1 + $0x8] sm:$0xff pattern:$0x75316420]  ;;  %v891_v35 = vld.sshfl [vmem:[#allocation1] sm:$0xff pattern:$0x75316420] }
  0xd0   : > { %897 = vrot.lane.b32.xlu2 %v892_v34, %s2648_s28  ;;  %986 = vst [vmem:[#allocation1] ss:$2 sm:$0xff] %v2930_v20 }
  0xd4   : > { %v2945_v36 = vld [vmem:[#allocation2 + $0x8] sm:$0xff]  ;;  %v616_v63 = vpop.permute.xlu0 %615 }
  0xd5   : > { %621 = vst [vmem:[#allocation1 + $0x10] ss:$2 sm:$0xff] %v2945_v36 }
  0xd7   : > { %v990_v37 = vld.sshfl [vmem:[#allocation1 + $0x8] sm:$0xff pattern:$0x75316420]  ;;  %v989_v38 = vld.sshfl [vmem:[#allocation1] sm:$0xff pattern:$0x75316420] }
  0xd8   : > { %895 = vrot.lane.b32.xlu2 %v891_v35, %s2648_s28  ;;  %993 = vrot.lane.b32.xlu0 %v989_v38, %s2653_s9  ;;  %1084 = vst [vmem:[#allocation1] ss:$2 sm:$0xff] %v2930_v20 }
  0xdc   : > { %v624_v40 = vld.sshfl [vmem:[#allocation1 + $0x10] sm:$0xff pattern:$0x75316420]  ;;  %v625_v41 = vld.sshfl [vmem:[#allocation1 + $0x18] sm:$0xff pattern:$0x75316420]  ;;  %v3002_v7 = vpop.permute.xlu0 %982 }
  0xdd   : > { %630 = vrot.lane.b32.xlu1 %v624_v40, %s2651_s7  ;;  %710 = vst [vmem:[#allocation1 + $0x10] ss:$2 sm:$0xff] %v612_v39 }
  0xdf   : > { %v1088_v42 = vld.sshfl [vmem:[#allocation1 + $0x8] sm:$0xff pattern:$0x75316420]  ;;  %v1087_v43 = vld.sshfl [vmem:[#allocation1] sm:$0xff pattern:$0x75316420] }
  0xe0   : > { %1093 = vrot.lane.b32.xlu0 %v1088_v42, %s2654_s10  ;;  %632 = vrot.lane.b32.xlu2 %v625_v41, %s2651_s7  ;;  %1182 = vst [vmem:[#allocation1] ss:$2 sm:$0xff] %v2930_v20 }
  0xe4   : > { %v2955_v44 = vld.sshfl [vmem:[#allocation1 + $0x10] sm:$0xff pattern:$0x75316420]  ;;  %v3007_v9 = vpop.permute.xlu0 %1276 }
  0xe5   : > { %995 = vrot.lane.b32.xlu1 %v990_v37, %s2653_s9  ;;  %792 = vst [vmem:[#allocation1 + $0x10] ss:$2 sm:$0xff] %v2945_v36 }
  0xe7   : > { %v1186_v45 = vld.sshfl [vmem:[#allocation1 + $0x8] sm:$0xff pattern:$0x75316420]  ;;  %v1185_v46 = vld.sshfl [vmem:[#allocation1] sm:$0xff pattern:$0x75316420] }
  0xe8   : > { %1091 = vrot.lane.b32.xlu0 %v1087_v43, %s2654_s10  ;;  %1191 = vrot.lane.b32.xlu2 %v1186_v45, %s2655_s11  ;;  %1280 = vst [vmem:[#allocation1] ss:$2 sm:$0xff] %v2930_v20 }
  0xec   : > { %v796_v47 = vld.sshfl [vmem:[#allocation1 + $0x18] sm:$0xff pattern:$0x75316420]  ;;  %v795_v48 = vld.sshfl [vmem:[#allocation1 + $0x10] sm:$0xff pattern:$0x75316420] }
  0xed   : > { %803 = vrot.lane.b32.xlu1 %v796_v47, %s2652_s8  ;;  %890 = vst [vmem:[#allocation1 + $0x10] ss:$2 sm:$0xff] %v2945_v36 }
  0xef   : > { %v1283_v49 = vld.sshfl [vmem:[#allocation1] sm:$0xff pattern:$0x75316420]  ;;  %v1284_v50 = vld.sshfl [vmem:[#allocation1 + $0x8] sm:$0xff pattern:$0x75316420] }
  0xf0   : > { %801 = vrot.lane.b32.xlu0 %v795_v48, %s2652_s8  ;;  %1378 = vst [vmem:[#allocation1] ss:$2 sm:$0xff] %v2930_v20 }
  0xf4   : > { %v894_v16 = vld.sshfl [vmem:[#allocation1 + $0x18] sm:$0xff pattern:$0x75316420]  ;;  %v893_v0 = vld.sshfl [vmem:[#allocation1 + $0x10] sm:$0xff pattern:$0x75316420] }
  0xf5   : > { %1189 = vrot.lane.b32.xlu1 %v1185_v46, %s2655_s11  ;;  %901 = vrot.lane.b32.xlu2 %v894_v16, %s2648_s28  ;;  %988 = vst [vmem:[#allocation1 + $0x10] ss:$2 sm:$0xff] %v2945_v36 }
  0xf7   : > { %v1381_v51 = vld.sshfl [vmem:[#allocation1] sm:$0xff pattern:$0x75316420]  ;;  %v1382_v52 = vld.sshfl [vmem:[#allocation1 + $0x8] sm:$0xff pattern:$0x75316420] }
  0xf8   : > { %899 = vrot.lane.b32.xlu0 %v893_v0, %s2648_s28  ;;  %2241 = vst [vmem:[#allocation1] ss:$2 sm:$0xff] %v2930_v20 }
  0xfc   : > { %v992_v53 = vld.sshfl [vmem:[#allocation1 + $0x18] sm:$0xff pattern:$0x75316420]  ;;  %v991_v54 = vld.sshfl [vmem:[#allocation1 + $0x10] sm:$0xff pattern:$0x75316420] }
  0xfd   : > { %1289 = vrot.lane.b32.xlu1 %v1284_v50, %s2656_s12  ;;  %999 = vrot.lane.b32.xlu2 %v992_v53, %s2653_s9  ;;  %1086 = vst [vmem:[#allocation1 + $0x10] ss:$2 sm:$0xff] %v2945_v36 }
 0x104   : > { %v1090_v17 = vld.sshfl [vmem:[#allocation1 + $0x18] sm:$0xff pattern:$0x75316420]  ;;  %v1089_v55 = vld.sshfl [vmem:[#allocation1 + $0x10] sm:$0xff pattern:$0x75316420] }
 0x105   : > { %1385 = vrot.lane.b32.xlu2 %v1381_v51, %s2657_s13  ;;  %997 = vrot.lane.b32.xlu1 %v991_v54, %s2653_s9  ;;  %1184 = vst [vmem:[#allocation1 + $0x10] ss:$2 sm:$0xff] %v2945_v36 }
 0x106   : > { %1097 = vrot.lane.b32.xlu0 %v1090_v17, %s2654_s10 }
 0x10c   : > { %v1188_v1 = vld.sshfl [vmem:[#allocation1 + $0x18] sm:$0xff pattern:$0x75316420]  ;;  %v1187_v21 = vld.sshfl [vmem:[#allocation1 + $0x10] sm:$0xff pattern:$0x75316420] }
 0x10d   : > { %1095 = vrot.lane.b32.xlu1 %v1089_v55, %s2654_s10  ;;  %1193 = vrot.lane.b32.xlu2 %v1187_v21, %s2655_s11  ;;  %1282 = vst [vmem:[#allocation1 + $0x10] ss:$2 sm:$0xff] %v2945_v36  ;;  %v2659_v21 = vmov 0  }
 0x10e   : > { %1195 = vrot.lane.b32.xlu0 %v1188_v1, %s2655_s11  ;;  %v1468_v1 = vld [vmem:[%s3248_s4] sm:$0xff]  ;;  %2537 = vset.pattern.permute.xlu2 %v2659_v21 }
 0x10f   : > { %2618 = vset.pattern.permute.xlu0 %v2659_v21 }
 0x112   : > { %v629_v61 = vpop.permute.xlu2 %628 }
 0x114   : > { %v1285_v56 = vld.sshfl [vmem:[#allocation1 + $0x10] sm:$0xff pattern:$0x75316420]  ;;  %v1286_v57 = vld.sshfl [vmem:[#allocation1 + $0x18] sm:$0xff pattern:$0x75316420] }
 0x115   : > { %1287 = vrot.lane.b32.xlu1 %v1283_v49, %s2656_s12  ;;  %1291 = vrot.lane.b32.xlu2 %v1285_v56, %s2656_s12  ;;  %1380 = vst [vmem:[#allocation1 + $0x10] ss:$2 sm:$0xff] %v2945_v36 }
 0x116   : > { %1387 = vrot.lane.b32.xlu0 %v1382_v52, %s2657_s13 }
 0x11c   : > { %v1383_v59 = vld.sshfl [vmem:[#allocation1 + $0x10] sm:$0xff pattern:$0x75316420]  ;;  %v1384_v3 = vld.sshfl [vmem:[#allocation1 + $0x18] sm:$0xff pattern:$0x75316420] }
 0x11d   : > { %1293 = vrot.lane.b32.xlu1 %v1286_v57, %s2656_s12  ;;  %2243 = vst [vmem:[#allocation1 + $0x10] ss:$2 sm:$0xff] %v2945_v36  ;;  %1374 = vrot.lane.b32.xlu2 %v2918_v62, %s2658_s14 }
 0x11e   : > { %1389 = vrot.lane.b32.xlu0 %v1383_v59, %s2657_s13 }
 0x125   : > { %1391 = vrot.lane.b32.xlu1 %v1384_v3, %s2657_s13  ;;  %1471 = vperm.xlu2 %2537, %v1468_v1  }
 0x12a   : > { %v627_v4 = vpop.permute.xlu1 %626  ;;  %v898_v5 = vpop.permute.xlu2 %897 }
 0x12b   : > { %v635_v6 = vsel %vm634_vm3, %v627_v4, %v629_v61 }
 0x12c   : > { %2399 = vmatpush.msk.msra.mxu0 %vm254_vm7, %v635_v6 }
 0x12d   : > { %2400 = vmatmul.msk.f32.vlgmr.msra.gmra.mxu0 %vm638_vm2, %v616_v63 }
 0x12e   : > { %2407 = vmatpush.msk.msrb.mxu0 %vm254_vm7, %v2936_v30 }
 0x132   : > { %v896_v8 = vpop.permute.xlu2 %895 }
 0x133   : > { %v904_v25 = vsel %vm903_vm5, %v896_v8, %v898_v5 }
 0x135   : > { %2408 = vmatmul.msk.f32.vlgmr.msrb.gmra.mxu0 %vm638_vm2, %v2918_v62 }
 0x13a   : > { %v633_v10 = vpop.permute.xlu2 %632  ;;  %v798_v11 = vpop.permute.xlu0 %797 }
 0x13b   : > { %v800_v12 = vpop.permute.xlu1 %799 }
 0x13c   : > { %v806_v22 = vsel %vm805_vm4, %v798_v11, %v800_v12 }
 0x142   : > { %v3009_v13 = vpop.permute.xlu2 %1191 }
 0x144   : > { %v739_v4 = vpop.f32.mrf.mxu3 }
 0x14a   : > { %v994_v14 = vpop.permute.xlu0 %993 }
 0x14f   : > { %v631_v15 = vpop.permute.xlu1 %630  ;;  %v902_v18 = vpop.permute.xlu2 %901 }
 0x150   : > { %v636_v19 = vsel %vm634_vm3, %v629_v61, %v631_v15  ;;  %v637_v20 = vsel %vm634_vm3, %v631_v15, %v633_v10  ;;  %v3110_v15 = vld [vmem:[%s3247_s3] sm:$0xff] }
 0x151   : > { %2401 = vmatpush.msk.msra.mxu1 %vm254_vm7, %v636_v19  ;;  %2403 = vmatpush.msk.msra.mxu2 %vm254_vm7, %v637_v20 }
 0x152   : > { %2402 = vmatmul.msk.f32.vlgmr.msra.gmra.mxu1 %vm638_vm2, %v616_v63  ;;  %2404 = vmatmul.msk.f32.vlgmr.msra.gmra.mxu2 %vm638_vm2, %v616_v63  ;;  %v1094_v23 = vpop.permute.xlu0 %1093 }
 0x153   : > { %2409 = vmatpush.msk.msrb.mxu1 %vm254_vm7, %v2955_v44  ;;  %2411 = vmatpush.msk.msrb.mxu2 %vm254_vm7, %v806_v22 }
 0x154   : > { %1502 = vrot.lane.b32.xlu1 %v3110_v15, %s2644_s23 }
 0x155   : > { %2417 = vmatpush.msk.msra.mxu1 %vm254_vm7, %v904_v25 }
 0x157   : > { %v996_v27 = vpop.permute.xlu1 %995  ;;  %v1000_v28 = vpop.permute.xlu2 %999 }
 0x15a   : > { %2410 = vmatmul.msk.f32.vlgmr.msrb.gmra.mxu1 %vm638_vm2, %v2918_v62  ;;  %2412 = vmatmul.msk.f32.vlgmr.msrb.gmra.mxu2 %vm638_vm2, %v2980_v26  ;;  %v1092_v29 = vpop.permute.xlu0 %1091  ;;  %v1002_v62 = vsel %vm1001_vm8, %v994_v14, %v996_v27 }
 0x15b   : > { %v1100_v40 = vsel %vm1099_vm9, %v1092_v29, %v1094_v23 }
 0x15c   : > { %1662 = vrot.lane.b32.xlu1 %v3110_v15, %s2649_s29  ;;  %s2663_s29 = smov 72  }
 0x15f   : > { %v804_v30 = vpop.permute.xlu1 %803  ;;  %v1386_v31 = vpop.permute.xlu2 %1385 }
 0x162   : > { %2418 = vmatmul.msk.f32.vlgmr.msra.gmra.mxu1 %vm638_vm2, %v2987_v58  ;;  %v802_v32 = vpop.permute.xlu0 %801 }
 0x163   : > { %v808_v33 = vsel %vm805_vm4, %v802_v32, %v804_v30  ;;  %v807_v34 = vsel %vm805_vm4, %v800_v12, %v802_v32 }
 0x164   : > { %2413 = vmatpush.msk.msrb.mxu3 %vm254_vm7, %v807_v34  ;;  %2415 = vmatpush.msk.msra.mxu0 %vm254_vm7, %v808_v33 }
 0x165   : > { %2414 = vmatmul.msk.f32.vlgmr.msrb.gmra.mxu3 %vm638_vm2, %v2980_v26  ;;  %2416 = vmatmul.msk.f32.vlgmr.msra.gmra.mxu0 %vm638_vm2, %v2980_v26 }
 0x166   : > { %2423 = vmatpush.msk.msrb.mxu0 %vm254_vm7, %v1002_v62 }
 0x167   : > { %v1190_v35 = vpop.permute.xlu1 %1189  ;;  %v1194_v37 = vpop.permute.xlu2 %1193 }
 0x168   : > { %v1199_v41 = vsel %vm1197_vm10, %v3009_v13, %v1194_v37  ;;  %v1198_v48 = vsel %vm1197_vm10, %v1190_v35, %v3009_v13 }
 0x16a   : > { %v900_v36 = vpop.permute.xlu0 %899 }
 0x16b   : > { %v905_v38 = vsel %vm903_vm5, %v898_v5, %v900_v36  ;;  %v906_v39 = vsel %vm903_vm5, %v900_v36, %v902_v18 }
 0x16c   : > { %2419 = vmatpush.msk.msra.mxu2 %vm254_vm7, %v905_v38  ;;  %2421 = vmatpush.msk.msra.mxu3 %vm254_vm7, %v906_v39 }
 0x16d   : > { %2420 = vmatmul.msk.f32.vlgmr.msra.gmra.mxu2 %vm638_vm2, %v2987_v58  ;;  %2422 = vmatmul.msk.f32.vlgmr.msra.gmra.mxu3 %vm638_vm2, %v2987_v58 }
 0x16e   : > { %2424 = vmatmul.msk.f32.vlgmr.msrb.gmra.mxu0 %vm638_vm2, %v3002_v7  ;;  %2429 = vmatpush.msk.msrb.mxu3 %vm254_vm7, %v1100_v40 }
 0x16f   : > { %v1290_v42 = vpop.permute.xlu1 %1289  ;;  %v1292_v44 = vpop.permute.xlu2 %1291 }
 0x170   : > { %2437 = vmatpush.msk.msra.mxu3 %vm254_vm7, %v1199_v41  ;;  %v1297_v49 = vsel %vm1295_vm11, %v1290_v42, %v1292_v44 }
 0x175   : > { %2430 = vmatmul.msk.f32.vlgmr.msrb.gmra.mxu3 %vm638_vm2, %v2989_v2 }
 0x177   : > { %v998_v43 = vpop.permute.xlu1 %997  ;;  %v1375_v58 = vpop.permute.xlu2 %1374 }
 0x178   : > { %v1003_v45 = vsel %vm1001_vm8, %v996_v27, %v998_v43  ;;  %v1004_v46 = vsel %vm1001_vm8, %v998_v43, %v1000_v28  ;;  %v1098_v47 = vpop.permute.xlu0 %1097 }
 0x179   : > { %2425 = vmatpush.msk.msrb.mxu1 %vm254_vm7, %v1003_v45  ;;  %2427 = vmatpush.msk.msrb.mxu2 %vm254_vm7, %v1004_v46 }
 0x17a   : > { %2426 = vmatmul.msk.f32.vlgmr.msrb.gmra.mxu1 %vm638_vm2, %v3002_v7  ;;  %2428 = vmatmul.msk.f32.vlgmr.msrb.gmra.mxu2 %vm638_vm2, %v3002_v7 }
 0x17b   : > { %2435 = vmatpush.msk.msra.mxu2 %vm254_vm7, %v1198_v48  ;;  %v252_v48 = vld [vmem:[%s3245_s1] sm:$0x7] }
 0x17d   : > { %2443 = vmatpush.msk.msrb.mxu2 %vm254_vm7, %v1297_v49  ;;  %2438 = vmatmul.msk.f32.vlgmr.msra.gmra.mxu3 %vm638_vm2, %v2995_v60 }
 0x17f   : > { %v1096_v50 = vpop.permute.xlu1 %1095 }
 0x180   : > { %v1101_v16 = vsel %vm1099_vm9, %v1094_v23, %v1096_v50  ;;  %v1102_v0 = vsel %vm1099_vm9, %v1096_v50, %v1098_v47  ;;  %v1196_v51 = vpop.permute.xlu0 %1195 }
 0x181   : > { %v1200_v52 = vsel %vm1197_vm10, %v1194_v37, %v1196_v51  ;;  %2431 = vmatpush.msk.msra.mxu0 %vm254_vm7, %v1101_v16  ;;  %2433 = vmatpush.msk.msra.mxu1 %vm254_vm7, %v1102_v0  ;;  %v1481_v0 = vperm.slane %v252_v48, 0  ;;  %v1482_v51 = vperm.slane %v252_v48, 1 }
 0x182   : > { %2432 = vmatmul.msk.f32.vlgmr.msra.gmra.mxu0 %vm638_vm2, %v2989_v2  ;;  %2434 = vmatmul.msk.f32.vlgmr.msra.gmra.mxu1 %vm638_vm2, %v2989_v2 }
 0x183   : > { %2436 = vmatmul.msk.f32.vlgmr.msra.gmra.mxu2 %vm638_vm2, %v2995_v60  ;;  %2439 = vmatpush.msk.msrb.mxu0 %vm254_vm7, %v1200_v52 }
 0x187   : > { %v1288_v53 = vpop.permute.xlu1 %1287 }
 0x188   : > { %v1296_v54 = vsel %vm1295_vm11, %v1288_v53, %v1290_v42  ;;  %v1388_v17 = vpop.permute.xlu0 %1387 }
 0x189   : > { %v1394_v55 = vsel %vm1393_vm12, %v1386_v31, %v1388_v17  ;;  %2441 = vmatpush.msk.msrb.mxu1 %vm254_vm7, %v1296_v54 }
 0x18a   : > { %2447 = vmatpush.msk.msra.mxu0 %vm254_vm7, %v1394_v55  ;;  %2442 = vmatmul.msk.f32.vlgmr.msrb.gmra.mxu1 %vm638_vm2, %v3007_v9 }
 0x18b   : > { %2440 = vmatmul.msk.f32.vlgmr.msrb.gmra.mxu0 %vm638_vm2, %v2995_v60  ;;  %2444 = vmatmul.msk.f32.vlgmr.msrb.gmra.mxu2 %vm638_vm2, %v3007_v9 }
 0x18f   : > { %v1294_v26 = vpop.permute.xlu1 %1293 }
 0x190   : > { %v1298_v56 = vsel %vm1295_vm11, %v1292_v44, %v1294_v26  ;;  %v1390_v57 = vpop.permute.xlu0 %1389  ;;  %v1472_v44 = vpop.permute.xlu2 %1471 }
 0x191   : > { %v1395_v2 = vsel %vm1393_vm12, %v1388_v17, %v1390_v57  ;;  %2445 = vmatpush.msk.msrb.mxu3 %vm254_vm7, %v1298_v56 }
 0x192   : > { %2449 = vmatpush.msk.msra.mxu1 %vm254_vm7, %v1395_v2  ;;  %2446 = vmatmul.msk.f32.vlgmr.msrb.gmra.mxu3 %vm638_vm2, %v3007_v9 }
 0x193   : > { %2448 = vmatmul.msk.f32.vlgmr.msra.gmra.mxu0 %vm638_vm2, %v1375_v58  ;;  %2450 = vmatmul.msk.f32.vlgmr.msra.gmra.mxu1 %vm638_vm2, %v1375_v58 }
 0x197   : > { %v1392_v59 = vpop.permute.xlu1 %1391 }
 0x198   : > { %v1396_v3 = vsel %vm1393_vm12, %v1390_v57, %v1392_v59 }
 0x199   : > { %2451 = vmatpush.msk.msra.mxu2 %vm254_vm7, %v1396_v3 }
 0x19a   : > { %2452 = vmatmul.msk.f32.vlgmr.msra.gmra.mxu2 %vm638_vm2, %v1375_v58 }
 0x1aa   : > { %v664_v61 = vpop.f32.mrf.mxu0 }
 0x1ab   : > { %v740_v19 = vadd.f32 %v739_v4, %v664_v61 }
 0x1b2   : > { %v759_v5 = vpop.f32.mrf.mxu0 }
 0x1cf   : > { %v684_v60 = vpop.f32.mrf.mxu1 }
 0x1d0   : > { %v760_v25 = vadd.f32 %v759_v5, %v684_v60 }
 0x1d5   : > { %v704_v63 = vpop.f32.mrf.mxu2 }
 0x1d7   : > { %v779_v6 = vpop.f32.mrf.mxu1 }
 0x1d8   : > { %v780_v40 = vadd.f32 %v779_v6, %v704_v63  ;;  %v1483_v63 = vperm.slane %v252_v48, 2  ;;  %v1896_v6 = vld [vmem:[#allocation3 + $0x20] sm:$0xff] }
 0x1dd   : > { %v834_v8 = vpop.f32.mrf.mxu2 }
 0x1de   : > { %v877_v27 = vadd.f32 %v834_v8, %v740_v19 }
 0x1df   : > { %v932_v10 = vpop.f32.mrf.mxu1 }
 0x1e0   : > { %v975_v29 = vadd.f32 %v932_v10, %v877_v27  ;;  %v2245_v10 = vld.sshfl [vmem:[#allocation1 + $0x8] sm:$0xff pattern:$0x75316420] }
 0x1e2   : > { %v874_v9 = vpop.f32.mrf.mxu0 }
 0x1e3   : > { %v879_v45 = vadd.f32 %v874_v9, %v780_v40 }
 0x1e8   : > { %v854_v7 = vpop.f32.mrf.mxu3 }
 0x1e9   : > { %v878_v28 = vadd.f32 %v854_v7, %v760_v25  ;;  %v1503_v25 = vpop.permute.xlu1 %1502 }
 0x1eb   : > { %v1030_v13 = vpop.f32.mrf.mxu0 }
 0x1ec   : > { %v1073_v32 = vadd.f32 %v1030_v13, %v975_v29  ;;  %v2246_v13 = vld.sshfl [vmem:[#allocation1 + $0x10] sm:$0xff pattern:$0x75316420] }
 0x1f0   : > { %v952_v11 = vpop.f32.mrf.mxu2  ;;  %v972_v12 = vpop.f32.mrf.mxu3 }
 0x1f1   : > { %v976_v30 = vadd.f32 %v952_v11, %v878_v28  ;;  %v977_v16 = vadd.f32 %v972_v12, %v879_v45  ;;  %v2244_v11 = vld.sshfl [vmem:[#allocation1] sm:$0xff pattern:$0x75316420]  ;;  %v2247_v12 = vld.sshfl [vmem:[#allocation1 + $0x18] sm:$0xff pattern:$0x75316420] }
 0x1f7   : > { %v1050_v14 = vpop.f32.mrf.mxu1 }
 0x1f8   : > { %v1128_v23 = vpop.f32.mrf.mxu3  ;;  %v1074_v33 = vadd.f32 %v1050_v14, %v976_v30  ;;  %v2226_v14 = vld [vmem:[%s3249_s5] sm:$0xff] }
 0x1f9   : > { %v1171_v35 = vadd.f32 %v1128_v23, %v1073_v32 }
 0x1fd   : > { %v1070_v18 = vpop.f32.mrf.mxu2 }
 0x1fe   : > { %v1075_v54 = vadd.f32 %v1070_v18, %v977_v16 }
 0x1ff   : > { %v1148_v20 = vpop.f32.mrf.mxu0  ;;  %v1168_v22 = vpop.f32.mrf.mxu1 }
 0x200   : > { %v1172_v36 = vadd.f32 %v1148_v20, %v1074_v33  ;;  %v1246_v37 = vpop.f32.mrf.mxu3  ;;  %v1173_v26 = vadd.f32 %v1168_v22, %v1075_v54  ;;  %v1663_v33 = vpop.permute.xlu1 %1662 }
 0x202   : > { %v1270_v39 = vadd.f32 %v1246_v37, %v1172_v36 }
 0x206   : > { %v1226_v31 = vpop.f32.mrf.mxu2 }
 0x207   : > { %v1324_v34 = vpop.f32.mrf.mxu1  ;;  %v1269_v38 = vadd.f32 %v1226_v31, %v1171_v35 }
 0x208   : > { %v1266_v62 = vpop.f32.mrf.mxu0 }
 0x209   : > { %v1367_v42 = vadd.f32 %v1324_v34, %v1269_v38  ;;  %v1271_v2 = vadd.f32 %v1266_v62, %v1173_v26 }
 0x20e   : > { %v1344_v41 = vpop.f32.mrf.mxu2 }
 0x20f   : > { %v1368_v43 = vadd.f32 %v1344_v41, %v1270_v39 }
 0x210   : > { %v1422_v46 = vpop.f32.mrf.mxu0  ;;  %v1442_v47 = vpop.f32.mrf.mxu1 }
 0x211   : > { %v1465_v49 = vadd.f32 %v1422_v46, %v1367_v42  ;;  %v1466_v50 = vadd.f32 %v1442_v47, %v1368_v43 }
 0x213   : > { %v1474_v52 = vadd.f32 %v1472_v44, %v1465_v49  ;;  %v1475_v53 = vadd.f32 %v1472_v44, %v1466_v50 }
 0x215   : > { %v1477_v17 = vmax.f32 %v1474_v52, 0.0  ;;  %v1478_v55 = vmax.f32 %v1475_v53, 0.0  ;;  %v1364_v56 = vpop.f32.mrf.mxu3 }
 0x216   : > { %v1369_v59 = vadd.f32 %v1364_v56, %v1271_v2 }
 0x217   : > { %v3119_v1 = vmul.f32 %v1481_v0, %v1477_v17  ;;  %v3121_v21 = vmul.f32 %v1482_v51, %v1478_v55 }
 0x219   : > { %v2538_v57 = vpack.i.bf16 %v3119_v1, %v2639_v24  ;;  %v2548_v58 = vpack.i.bf16 %v3121_v21, %v3119_v1  ;;  %v2578_v7 = vpack.i.bf16 %v3119_v1, %v1896_v6 }
 0x21b   : > { %2539 = vrot.lane.b32.xlu0 %v2538_v57, %s2660_s25  ;;  %2549 = vrot.lane.b32.xlu2 %v2548_v58, %s2661_s26 }
 0x21d   : > { %v1462_v3 = vpop.f32.mrf.mxu2 }
 0x21e   : > { %v1467_v60 = vadd.f32 %v1462_v3, %v1369_v59 }
 0x220   : > { %v1476_v61 = vadd.f32 %v1472_v44, %v1467_v60 }
 0x222   : > { %v1479_v4 = vmax.f32 %v1476_v61, 0.0 }
 0x223   : > { %2544 = vrot.lane.b32.xlu0 %v2538_v57, %s2627_s27 }
 0x224   : > { %v3128_v5 = vmul.f32 %v1483_v63, %v1479_v4 }
 0x226   : > { %v2563_v24 = vpack.i.bf16 %v3128_v5, %v3121_v21  ;;  %v2568_v8 = vpack.i.bf16 0.0, %v3128_v5  ;;  %v2593_v9 = vpack.i.bf16 %v1896_v6, %v3128_v5 }
 0x228   : > { %2564 = vrot.lane.b32.xlu1 %v2563_v24, %s2627_s27  ;;  %2554 = vrot.lane.b32.xlu2 %v2563_v24, %s2660_s25  ;;  %s2662_s27 = smov 88  }
 0x22b   : > { %1744 = vrot.lane.b32.xlu0 %v3110_v15, %s2648_s28 }
 0x230   : > { %2579 = vrot.lane.b32.xlu1 %v2578_v7, %s2642_s17  ;;  %2559 = vrot.lane.b32.xlu2 %v2538_v57, %s2643_s18 }
 0x233   : > { %2569 = vrot.lane.b32.xlu0 %v2568_v8, %s2661_s26 }
 0x238   : > { %2589 = vrot.lane.b32.xlu1 %v2563_v24, %s2643_s18  ;;  %1826 = vrot.lane.b32.xlu2 %v3110_v15, %s2658_s14  ;;  %s2664_s18 = smov 64  }
 0x23b   : > { %2574 = vrot.lane.b32.xlu0 %v2548_v58, %s2651_s7 }
 0x240   : > { %2594 = vrot.lane.b32.xlu1 %v2593_v9, %s2651_s7  ;;  %1897 = vrot.lane.b32.xlu2 %v3110_v15, %s2662_s27  ;;  %s2489_s7 = smul.u32 24, %s3252_s22 }
 0x242   : > { %s251_s10 = scalar_lea.vmem %s3250_s6, %s2489_s7 }
 0x243   : > { %2584 = vrot.lane.b32.xlu0 %v2548_v58, %s2648_s28 }
 0x248   : > { %2064 = vrot.lane.b32.xlu1 %v3110_v15, %s2663_s29  ;;  %1982 = vrot.lane.b32.xlu2 %v3110_v15, %s2655_s11 }
 0x24b   : > { %2599 = vrot.lane.b32.xlu0 %v2563_v24, %s2642_s17  ;;  %s2665_s17 = smov 56  }
 0x250   : > { %2145 = vrot.lane.b32.xlu1 %v3110_v15, %s2664_s18  ;;  %2609 = vrot.lane.b32.xlu2 %v2593_v9, %s2648_s28 }
 0x253   : > { %2604 = vrot.lane.b32.xlu0 %v2548_v58, %s2653_s9 }
 0x258   : > { %2250 = vrot.lane.b32.xlu1 %v2245_v10, %s2653_s9  ;;  %2614 = vrot.lane.b32.xlu2 %v2593_v9, %s2653_s9 }
 0x25b   : > { %2248 = vrot.lane.b32.xlu0 %v2244_v11, %s2653_s9 }
 0x260   : > { %2254 = vrot.lane.b32.xlu1 %v2247_v12, %s2653_s9  ;;  %2252 = vrot.lane.b32.xlu2 %v2246_v13, %s2653_s9 }
 0x263   : > { %2237 = vrot.lane.b32.xlu0 %v3110_v15, %s2665_s17 }
 0x268   : > { %2229 = vperm.xlu2 %2537, %v2226_v14  }
 0x275   : > { %v2550_v18 = vpop.permute.xlu2 %2549 }
 0x276   : > { %v2552_v35 = vunpack.i.h.bf16 %v2550_v18  ;;  %v2551_v36 = vunpack.i.l.bf16 %v2550_v18 }
 0x278   : > { %v1674_v40 = vsel %vm1672_vm15, %v2551_v36, %v2552_v35 }
 0x282   : > { %v2555_v19 = vpop.permute.xlu2 %2554 }
 0x283   : > { %v2557_v20 = vunpack.i.h.bf16 %v2555_v19  ;;  %v2556_v22 = vunpack.i.l.bf16 %v2555_v19 }
 0x285   : > { %v1519_v23 = vsel %vm1516_vm13, %v2556_v22, %v2557_v20 }
 0x286   : > { %1581 = vmatpush.msrb.mxu1 %v1519_v23 }
 0x287   : > { %2455 = vmatmul.msk.f32.vlgmr.msrb.gmra.mxu1 %vm1523_vm14, %v1503_v25 }
 0x28a   : > { %v2560_v27 = vpop.permute.xlu2 %2559 }
 0x28b   : > { %v2562_v42 = vunpack.i.h.bf16 %v2560_v27  ;;  %v2561_v43 = vunpack.i.l.bf16 %v2560_v27 }
 0x28d   : > { %v2540_v28 = vpop.permute.xlu0 %2539  ;;  %v1755_v50 = vsel %vm1754_vm0, %v2561_v43, %v2562_v42 }
 0x28e   : > { %v2542_v29 = vunpack.i.h.bf16 %v2540_v28  ;;  %v2541_v30 = vunpack.i.l.bf16 %v2540_v28 }
 0x290   : > { %v1517_v31 = vsel %vm1516_vm13, %v2541_v30, %v2542_v29  ;;  %v1518_v32 = vsel %vm1516_vm13, %v2542_v29, %v2556_v22 }
 0x291   : > { %1541 = vmatpush.msra.mxu3 %v1517_v31  ;;  %1561 = vmatpush.msrb.mxu0 %v1518_v32 }
 0x292   : > { %2453 = vmatmul.msk.f32.vlgmr.msra.gmra.mxu3 %vm1523_vm14, %v1503_v25  ;;  %2454 = vmatmul.msk.f32.vlgmr.msrb.gmra.mxu0 %vm1523_vm14, %v1503_v25  ;;  %v3166_v34 = vpop.permute.xlu2 %1826 }
 0x295   : > { %v2545_v62 = vpop.permute.xlu0 %2544 }
 0x296   : > { %v2547_v37 = vunpack.i.h.bf16 %v2545_v62  ;;  %v2546_v38 = vunpack.i.l.bf16 %v2545_v62 }
 0x298   : > { %v1594_v39 = vsel %vm1491_vm6, %v2546_v38, %v2547_v37 }
 0x299   : > { %1617 = vmatpush.msrb.mxu2 %v1594_v39 }
 0x29a   : > { %2456 = vmatmul.msk.f32.vlgmr.msrb.gmra.mxu2 %vm1523_vm14, %v3110_v15  ;;  %v2565_v41 = vpop.permute.xlu1 %2564  ;;  %v1898_v49 = vpop.permute.xlu2 %1897 }
 0x29b   : > { %1716 = vmatpush.msra.mxu2 %v1674_v40  ;;  %v2567_v44 = vunpack.i.h.bf16 %v2565_v41  ;;  %v2566_v45 = vunpack.i.l.bf16 %v2565_v41 }
 0x29d   : > { %v1745_v46 = vpop.permute.xlu0 %1744  ;;  %v1595_v47 = vsel %vm1491_vm6, %v2547_v37, %v2566_v45  ;;  %v1596_v48 = vsel %vm1491_vm6, %v2566_v45, %v2567_v44  ;;  %vm1992_vm6 = vcmask 859136  }
 0x29e   : > { %1637 = vmatpush.msrb.mxu3 %v1595_v47  ;;  %1657 = vmatpush.msra.mxu0 %v1596_v48 }
 0x29f   : > { %2457 = vmatmul.msk.f32.vlgmr.msrb.gmra.mxu3 %vm1523_vm14, %v3110_v15  ;;  %2458 = vmatmul.msk.f32.vlgmr.msra.gmra.mxu0 %vm1523_vm14, %v3110_v15 }
 0x2a0   : > { %1778 = vmatpush.msrb.mxu0 %v1755_v50 }
 0x2a2   : > { %1865 = vmatpush.msra.mxu0 %v3121_v21  ;;  %2460 = vmatmul.msk.f32.vlgmr.msra.gmra.mxu2 %vm1523_vm14, %v1663_v33  ;;  %v3181_v16 = vpop.permute.xlu1 %2579  ;;  %v3184_v53 = vpop.permute.xlu2 %1982 }
 0x2a3   : > { %v2582_v11 = vunpack.i.h.bf16 %v3181_v16  ;;  %v2581_v12 = vunpack.i.l.bf16 %v3181_v16 }
 0x2a5   : > { %v2570_v0 = vpop.permute.xlu0 %2569 }
 0x2a6   : > { %v2572_v51 = vunpack.i.h.bf16 %v2570_v0  ;;  %v2571_v52 = vunpack.i.l.bf16 %v2570_v0 }
 0x2a7   : > { %2462 = vmatmul.msk.f32.vlgmr.msrb.gmra.mxu0 %vm1523_vm14, %v1745_v46 }
 0x2a8   : > { %v1673_v54 = vsel %vm1672_vm15, %v2572_v51, %v2551_v36  ;;  %v1675_v15 = vsel %vm1672_vm15, %v2552_v35, %v2571_v52 }
 0x2a9   : > { %1696 = vmatpush.msra.mxu1 %v1673_v54  ;;  %1736 = vmatpush.msra.mxu3 %v1675_v15 }
 0x2aa   : > { %2459 = vmatmul.msk.f32.vlgmr.msra.gmra.mxu1 %vm1523_vm14, %v1663_v33  ;;  %2461 = vmatmul.msk.f32.vlgmr.msra.gmra.mxu3 %vm1523_vm14, %v1663_v33  ;;  %v2590_v17 = vpop.permute.xlu1 %2589  ;;  %v2610_v59 = vpop.permute.xlu2 %2609 }
 0x2ab   : > { %1845 = vmatpush.msrb.mxu3 %v3119_v1  ;;  %v2592_v55 = vunpack.i.h.bf16 %v2590_v17  ;;  %v2591_v21 = vunpack.i.l.bf16 %v2590_v17  ;;  %v2612_v18 = vunpack.i.h.bf16 %v2610_v59  ;;  %v2611_v19 = vunpack.i.l.bf16 %v2610_v59 }
 0x2ad   : > { %v2575_v26 = vpop.permute.xlu0 %2574  ;;  %v1756_v56 = vsel %vm1754_vm0, %v2562_v42, %v2591_v21  ;;  %v1757_v57 = vsel %vm1754_vm0, %v2591_v21, %v2592_v55  ;;  %v2076_v30 = vsel %vm903_vm5, %v2611_v19, %v2612_v18 }
 0x2ae   : > { %v2577_v58 = vunpack.i.h.bf16 %v2575_v26  ;;  %v2576_v2 = vunpack.i.l.bf16 %v2575_v26  ;;  %1798 = vmatpush.msrb.mxu1 %v1756_v56  ;;  %1818 = vmatpush.msrb.mxu2 %v1757_v57 }
 0x2af   : > { %2464 = vmatmul.msk.f32.vlgmr.msrb.gmra.mxu2 %vm1523_vm14, %v1745_v46  ;;  %2466 = vmatmul.msk.f32.vlgmr.msra.gmra.mxu0 %vm1523_vm14, %v3166_v34 }
 0x2b0   : > { %1885 = vmatpush.msra.mxu1 %v3128_v5  ;;  %v1911_v1 = vsel %vm634_vm3, %v2576_v2, %v2577_v58 }
 0x2b1   : > { %1934 = vmatpush.msra.mxu2 %v1911_v1 }
 0x2b2   : > { %2463 = vmatmul.msk.f32.vlgmr.msrb.gmra.mxu1 %vm1523_vm14, %v1745_v46  ;;  %2465 = vmatmul.msk.f32.vlgmr.msrb.gmra.mxu3 %vm1523_vm14, %v3166_v34  ;;  %v2595_v3 = vpop.permute.xlu1 %2594  ;;  %v2615_v9 = vpop.permute.xlu2 %2614 }
 0x2b3   : > { %v2597_v60 = vunpack.i.h.bf16 %v2595_v3  ;;  %v2596_v61 = vunpack.i.l.bf16 %v2595_v3  ;;  %v2617_v20 = vunpack.i.h.bf16 %v2615_v9  ;;  %v2616_v22 = vunpack.i.l.bf16 %v2615_v9 }
 0x2b5   : > { %v2585_v63 = vpop.permute.xlu0 %2584  ;;  %v1912_v4 = vsel %vm634_vm3, %v2577_v58, %v2596_v61  ;;  %v1913_v24 = vsel %vm634_vm3, %v2596_v61, %v2597_v60  ;;  %v2157_v31 = vsel %vm1001_vm8, %v2616_v22, %v2617_v20 }
 0x2b6   : > { %v2587_v6 = vunpack.i.h.bf16 %v2585_v63  ;;  %v2586_v7 = vunpack.i.l.bf16 %v2585_v63  ;;  %1954 = vmatpush.msra.mxu3 %v1912_v4  ;;  %1974 = vmatpush.msrb.mxu0 %v1913_v24 }
 0x2b7   : > { %2468 = vmatmul.msk.f32.vlgmr.msra.gmra.mxu2 %vm1523_vm14, %v1898_v49  ;;  %2470 = vmatmul.msk.f32.vlgmr.msrb.gmra.mxu0 %vm1523_vm14, %v1898_v49 }
 0x2b8   : > { %v2074_v5 = vsel %vm903_vm5, %v2586_v7, %v2587_v6  ;;  %v2075_v29 = vsel %vm903_vm5, %v2587_v6, %v2611_v19 }
 0x2b9   : > { %2097 = vmatpush.msra.mxu0 %v2074_v5 }
 0x2ba   : > { %2467 = vmatmul.msk.f32.vlgmr.msra.gmra.mxu1 %vm1523_vm14, %v3166_v34  ;;  %2469 = vmatmul.msk.f32.vlgmr.msra.gmra.mxu3 %vm1523_vm14, %v1898_v49  ;;  %v2065_v8 = vpop.permute.xlu1 %2064  ;;  %v2253_v36 = vpop.permute.xlu2 %2252 }
 0x2bd   : > { %v2600_v10 = vpop.permute.xlu0 %2599 }
 0x2be   : > { %v2602_v13 = vunpack.i.h.bf16 %v2600_v10  ;;  %v2601_v14 = vunpack.i.l.bf16 %v2600_v10 }
 0x2bf   : > { %2474 = vmatmul.msk.f32.vlgmr.msra.gmra.mxu0 %vm1523_vm14, %v2065_v8 }
 0x2c0   : > { %v1993_v23 = vsel %vm1992_vm6, %v2582_v11, %v2601_v14  ;;  %v1994_v25 = vsel %vm1992_vm6, %v2601_v14, %v2602_v13  ;;  %v1995_v27 = vsel %vm1992_vm6, %v2602_v13, %v2581_v12 }
 0x2c1   : > { %2016 = vmatpush.msrb.mxu1 %v1993_v23  ;;  %2036 = vmatpush.msrb.mxu2 %v1994_v25 }
 0x2c2   : > { %2056 = vmatpush.msrb.mxu3 %v1995_v27  ;;  %2471 = vmatmul.msk.f32.vlgmr.msrb.gmra.mxu1 %vm1523_vm14, %v3184_v53  ;;  %v2146_v28 = vpop.permute.xlu1 %2145 }
 0x2c3   : > { %2472 = vmatmul.msk.f32.vlgmr.msrb.gmra.mxu2 %vm1523_vm14, %v3184_v53  ;;  %2473 = vmatmul.msk.f32.vlgmr.msrb.gmra.mxu3 %vm1523_vm14, %v3184_v53 }
 0x2c4   : > { %2117 = vmatpush.msra.mxu1 %v2075_v29  ;;  %2137 = vmatpush.msra.mxu2 %v2076_v30  ;;  %v2230_v29 = vpop.permute.xlu2 %2229 }
 0x2c5   : > { %v2605_v32 = vpop.permute.xlu0 %2604 }
 0x2c6   : > { %2218 = vmatpush.msrb.mxu1 %v2157_v31  ;;  %v2607_v33 = vunpack.i.h.bf16 %v2605_v32  ;;  %v2606_v34 = vunpack.i.l.bf16 %v2605_v32 }
 0x2c8   : > { %v2155_v62 = vsel %vm1001_vm8, %v2606_v34, %v2607_v33  ;;  %v2156_v35 = vsel %vm1001_vm8, %v2607_v33, %v2616_v22 }
 0x2c9   : > { %2178 = vmatpush.msra.mxu3 %v2155_v62  ;;  %2198 = vmatpush.msrb.mxu0 %v2156_v35 }
 0x2ca   : > { %2475 = vmatmul.msk.f32.vlgmr.msra.gmra.mxu1 %vm1523_vm14, %v2065_v8  ;;  %2478 = vmatmul.msk.f32.vlgmr.msrb.gmra.mxu0 %vm1523_vm14, %v2146_v28  ;;  %v2251_v37 = vpop.permute.xlu1 %2250 }
 0x2cb   : > { %2476 = vmatmul.msk.f32.vlgmr.msra.gmra.mxu2 %vm1523_vm14, %v2065_v8  ;;  %2477 = vmatmul.msk.f32.vlgmr.msra.gmra.mxu3 %vm1523_vm14, %v2146_v28  ;;  %v2257_v38 = vsel %vm1001_vm8, %v2251_v37, %v2253_v36 }
 0x2cc   : > { %2482 = vmatpush.msk.msrb.mxu3 %vm254_vm7, %v2257_v38 }
 0x2cd   : > { %v2249_v39 = vpop.permute.xlu0 %2248 }
 0x2ce   : > { %v2256_v40 = vsel %vm1001_vm8, %v2249_v39, %v2251_v37 }
 0x2cf   : > { %2480 = vmatpush.msk.msrb.mxu2 %vm254_vm7, %v2256_v40 }
 0x2d2   : > { %2479 = vmatmul.msk.f32.vlgmr.msrb.gmra.mxu1 %vm1523_vm14, %v2146_v28  ;;  %v2255_v41 = vpop.permute.xlu1 %2254 }
 0x2d3   : > { %v2258_v42 = vsel %vm1001_vm8, %v2253_v36, %v2255_v41 }
 0x2d4   : > { %2484 = vmatpush.msk.msra.mxu0 %vm254_vm7, %v2258_v42 }
 0x2d5   : > { %v2238_v43 = vpop.permute.xlu0 %2237 }
 0x2d6   : > { %2481 = vmatmul.msk.f32.vlgmr.msrb.gmra.mxu2 %vm638_vm2, %v2238_v43  ;;  %2483 = vmatmul.msk.f32.vlgmr.msrb.gmra.mxu3 %vm638_vm2, %v2238_v43 }
 0x2d7   : > { %2485 = vmatmul.msk.f32.vlgmr.msra.gmra.mxu0 %vm638_vm2, %v2238_v43 }
 0x304   : > { %v1583_v47 = vpop.f32.mrf.mxu1 }
 0x30f   : > { %v1563_v44 = vpop.f32.mrf.mxu0 }
 0x315   : > { %v1543_v46 = vpop.f32.mrf.mxu3 }
 0x31c   : > { %v1659_v45 = vpop.f32.mrf.mxu0 }
 0x31d   : > { %v1619_v48 = vpop.f32.mrf.mxu2  ;;  %v1660_v58 = vadd.f32 %v1659_v45, %v1583_v47 }
 0x31e   : > { %v1620_v2 = vadd.f32 %v1619_v48, %v1543_v46 }
 0x322   : > { %v1639_v49 = vpop.f32.mrf.mxu3 }
 0x323   : > { %v1640_v26 = vadd.f32 %v1639_v49, %v1563_v44 }
 0x324   : > { %v1780_v50 = vpop.f32.mrf.mxu0 }
 0x325   : > { %v1718_v0 = vpop.f32.mrf.mxu2 }
 0x326   : > { %v1742_v1 = vadd.f32 %v1718_v0, %v1640_v26 }
 0x327   : > { %v1698_v16 = vpop.f32.mrf.mxu1 }
 0x328   : > { %v1741_v60 = vadd.f32 %v1698_v16, %v1620_v2 }
 0x32a   : > { %v1823_v5 = vadd.f32 %v1780_v50, %v1741_v60 }
 0x32c   : > { %v1867_v53 = vpop.f32.mrf.mxu0 }
 0x32d   : > { %v1738_v51 = vpop.f32.mrf.mxu3 }
 0x32e   : > { %v1743_v3 = vadd.f32 %v1738_v51, %v1660_v58 }
 0x32f   : > { %v1800_v52 = vpop.f32.mrf.mxu1 }
 0x330   : > { %v1824_v61 = vadd.f32 %v1800_v52, %v1742_v1 }
 0x332   : > { %v1820_v54 = vpop.f32.mrf.mxu2  ;;  %v1891_v8 = vadd.f32 %v1867_v53, %v1824_v61 }
 0x333   : > { %v1825_v63 = vadd.f32 %v1820_v54, %v1743_v3 }
 0x334   : > { %v1976_v55 = vpop.f32.mrf.mxu0 }
 0x335   : > { %v1847_v15 = vpop.f32.mrf.mxu3 }
 0x336   : > { %v1890_v9 = vadd.f32 %v1847_v15, %v1823_v5 }
 0x337   : > { %v1887_v17 = vpop.f32.mrf.mxu1 }
 0x338   : > { %v1892_v24 = vadd.f32 %v1887_v17, %v1825_v63 }
 0x33a   : > { %v1936_v56 = vpop.f32.mrf.mxu2  ;;  %v1981_v11 = vadd.f32 %v1976_v55, %v1892_v24 }
 0x33b   : > { %v1979_v12 = vadd.f32 %v1936_v56, %v1890_v9 }
 0x33c   : > { %v2099_v59 = vpop.f32.mrf.mxu0 }
 0x33d   : > { %v1956_v21 = vpop.f32.mrf.mxu3 }
 0x33e   : > { %v1980_v10 = vadd.f32 %v1956_v21, %v1891_v8 }
 0x33f   : > { %v2018_v57 = vpop.f32.mrf.mxu1 }
 0x340   : > { %v2061_v19 = vadd.f32 %v2018_v57, %v1979_v12 }
 0x342   : > { %v2142_v30 = vadd.f32 %v2099_v59, %v2061_v19 }
 0x346   : > { %v2038_v4 = vpop.f32.mrf.mxu2  ;;  %v2058_v6 = vpop.f32.mrf.mxu3 }
 0x347   : > { %v2119_v7 = vpop.f32.mrf.mxu1  ;;  %v2062_v13 = vadd.f32 %v2038_v4, %v1980_v10  ;;  %v2200_v14 = vpop.f32.mrf.mxu0  ;;  %v2063_v18 = vadd.f32 %v2058_v6, %v1981_v11 }
 0x349   : > { %v2143_v25 = vadd.f32 %v2119_v7, %v2062_v13 }
 0x34b   : > { %v2224_v32 = vadd.f32 %v2200_v14, %v2143_v25 }
 0x34d   : > { %v2233_v37 = vadd.f32 %v2230_v29, %v2224_v32 }
 0x34e   : > { %v2139_v20 = vpop.f32.mrf.mxu2  ;;  %v2180_v27 = vpop.f32.mrf.mxu3 }
 0x34f   : > { %v2144_v22 = vadd.f32 %v2139_v20, %v2063_v18  ;;  %v2220_v23 = vpop.f32.mrf.mxu1  ;;  %v2223_v33 = vadd.f32 %v2180_v27, %v2142_v30 }
 0x351   : > { %v2225_v28 = vadd.f32 %v2220_v23, %v2144_v22  ;;  %v2232_v36 = vadd.f32 %v2230_v29, %v2223_v33 }
 0x353   : > { %v2234_v31 = vadd.f32 %v2230_v29, %v2225_v28 }
 0x354   : > { %v2324_v34 = vpop.f32.mrf.mxu0 }
 0x355   : > { %v2329_v62 = vadd.f32 %v2324_v34, %v2234_v31 }
 0x357   : > { %v2332_v35 = vmax.f32 %v2329_v62, 0.0 }
 0x359   : > { %2335 = vst [vmem:[%s251_s10 + $0x10] sm:$0xff] %v2332_v35  ;;  %v2284_v38 = vpop.f32.mrf.mxu2  ;;  %v2304_v39 = vpop.f32.mrf.mxu3 }
 0x35a   : > { %v2327_v40 = vadd.f32 %v2284_v38, %v2232_v36  ;;  %v2328_v41 = vadd.f32 %v2304_v39, %v2233_v37 }
 0x35c   : > { %v2330_v42 = vmax.f32 %v2327_v40, 0.0  ;;  %v2331_v43 = vmax.f32 %v2328_v41, 0.0 }
 0x35e   : > { %2333 = vst [vmem:[%s251_s10] sm:$0xff] %v2330_v42 }
 0x35f   : > { %2334 = vst [vmem:[%s251_s10 + $0x8] sm:$0xff] %v2331_v43 }
 0x360 PF: > { %s16_s21 = sadd.s32 1, %s2625_s21  }
 0x361   : > { %p13_p4 = scmp.ge.s32.totalorder %s16_s21, 4  }
 0x363   :  { %15 = sbr.rel (!%p13_p4) target bundleno = 1 (0x1), region = 116 }

</bundles_post_ra>
